<compile_context>
chip_gen: v5e
topology: v5e:2x2
jax: 0.10.0
libtpu: 0.0.40
codegen_flags: <defaults>
</compile_context>

<pallas_src>
import numpy as np
import jax
import jax.numpy as jnp
from jax.experimental import pallas as pl
from jax.experimental.pallas import tpu as pltpu

NUM_NODES = 159
INPUT_DIM = 2
HIDDEN_DIM = 64
OUTPUT_DIM = 3
BATCH = 4                      # graphs per call (B=1 reproduces the module)

# TPU-friendly padded sizes (zero padding never changes the real outputs)
N_PAD = 160                    # nodes: multiple of 8 (f32) and 16 (bf16)
FIN_PAD = 8                    # real input dim is 2 (block == full array dim)
OUT_PAD = 32                   # per-graph output slot; BATCH*OUT_PAD = 128 lanes
HID_CAT = BATCH * HIDDEN_DIM   # 256 -- fills the 256-wide MXU on v6e/v7x
OUT_CAT = BATCH * OUT_PAD      # 128 -- lane-dense output stores


def gnn_kernel(adj_ref, x_ref, w1_ref, b1_ref, w2_ref, b2_ref, out_ref, xw_ref):
    """Whole batch in one grid-less step; everything VMEM-resident.

    adj_ref : [N_PAD, N_PAD]           bf16  normalized adjacency P
    x_ref   : [BATCH, N_PAD, FIN_PAD]  f32   node features (cols 0,1 real)
    w1_ref  : [FIN_PAD, HIDDEN_DIM]    f32   (rows 0,1 real)
    b1_ref  : [1, HID_CAT]             f32   b1 tiled per graph
    w2_ref  : [HID_CAT, OUT_CAT]       bf16  block-diagonal W2 (OUT padded to 32)
    b2_ref  : [1, OUT_CAT]             f32   b2 tiled per graph (padded)
    out_ref : [N_PAD, OUT_CAT]         bf16  batch folded into lanes
    xw_ref  : [N_PAD, HID_CAT]         f32   scratch: layer-1 linear result
    """
    # ---- layer-1 linear (real K = 2): two f32 VPU broadcast-FMAs per graph ----
    w1_r0 = w1_ref[0:1, :]                               # [1, HIDDEN_DIM]
    w1_r1 = w1_ref[1:2, :]
    for b in range(BATCH):                               # static unroll (B=4)
        xb = x_ref[b]                                    # [N_PAD, FIN_PAD]
        xw_ref[:, b * HIDDEN_DIM:(b + 1) * HIDDEN_DIM] = (
            xb[:, 0:1] * w1_r0 + xb[:, 1:2] * w1_r1)

    # ---- layer-1 aggregation (MXU, batch on lanes): P @ XW1 -> [160, 256] ----
    h = jnp.dot(adj_ref[...], xw_ref[...].astype(jnp.bfloat16),
                preferred_element_type=jnp.float32) + b1_ref[...]
    h = jnp.maximum(h, 0.0)                              # ReLU in f32 (v5e-safe)
    # F.dropout(training=False) == identity
    # TODO(synk): training-mode Bernoulli dropout mask is not implemented.

    # ---- layer-2 linear: one K=256 MXU dot with block-diagonal W2 ----
    hw = jnp.dot(h.astype(jnp.bfloat16), w2_ref[...],
                 preferred_element_type=jnp.float32)     # [N_PAD, OUT_CAT]

    # ---- layer-2 aggregation + bias; bf16 lane-dense store ----
    out = jnp.dot(adj_ref[...], hw.astype(jnp.bfloat16),
                  preferred_element_type=jnp.float32) + b2_ref[...]
    out_ref[...] = out.astype(out_ref.dtype)


def gnn_forward(adj_bf16, x_p, w1_p, b1_cat, w2_bd, b2_cat):
    """All arrays pre-padded/packed (see __main__). Returns [N_PAD, OUT_CAT] bf16."""
    flops = (2 * BATCH * N_PAD * INPUT_DIM * HIDDEN_DIM   # layer-1 linear (VPU)
             + 2 * N_PAD * N_PAD * HID_CAT                # aggregation 1
             + 2 * N_PAD * HID_CAT * OUT_CAT              # layer-2 linear
             + 2 * N_PAD * N_PAD * OUT_CAT)               # aggregation 2
    bytes_accessed = sum(int(a.size) * a.dtype.itemsize
                         for a in (adj_bf16, x_p, w1_p, b1_cat, w2_bd, b2_cat))
    bytes_accessed += N_PAD * OUT_CAT * 2                 # bf16 output writeback
    return pl.pallas_call(
        gnn_kernel,
        out_shape=jax.ShapeDtypeStruct((N_PAD, OUT_CAT), jnp.bfloat16),
        scratch_shapes=[pltpu.VMEM((N_PAD, HID_CAT), jnp.float32)],
        cost_estimate=pl.CostEstimate(flops=flops, transcendentals=0,
                                      bytes_accessed=bytes_accessed),
    )(adj_bf16, x_p, w1_p, b1_cat, w2_bd, b2_cat)


def build_normalized_adjacency(num_nodes):
    """Dense GCN-normalized adjacency matching PyG GCNConv (gcn_norm) with the
    directed upper-triangular edge_index (edges i -> j, i < j) plus self loops."""
    src, dst = np.triu_indices(num_nodes, k=1)            # edge i -> j, i < j
    a_hat = np.zeros((num_nodes, num_nodes), dtype=np.float32)
    a_hat[dst, src] = 1.0                                  # message src -> dst
    a_hat += np.eye(num_nodes, dtype=np.float32)           # add self loops
    deg = a_hat.sum(axis=1)                                # in-degree + 1
    d_inv_sqrt = 1.0 / np.sqrt(deg)
    return jnp.asarray(d_inv_sqrt[:, None] * a_hat * d_inv_sqrt[None, :],
                       dtype=jnp.float32)


def pad_to(a, shape):
    out = jnp.zeros(shape, dtype=jnp.float32)
    return out.at[tuple(slice(0, s) for s in a.shape)].set(a.astype(jnp.float32))


if __name__ == "__main__":
    key = jax.random.PRNGKey(0)
    k_x, k_w1, k_b1, k_w2, k_b2 = jax.random.split(key, 5)

    # batch of node-feature sets (torch.randn(num_nodes, input_dim) analogue)
    x = jax.random.normal(k_x, (BATCH, NUM_NODES, INPUT_DIM), dtype=jnp.float32)

    def glorot(k, fan_in, fan_out):
        lim = float(np.sqrt(6.0 / (fan_in + fan_out)))
        return jax.random.uniform(k, (fan_in, fan_out), jnp.float32, -lim, lim)

    w1 = glorot(k_w1, INPUT_DIM, HIDDEN_DIM)
    b1 = jax.random.normal(k_b1, (1, HIDDEN_DIM), dtype=jnp.float32) * 0.01
    w2 = glorot(k_w2, HIDDEN_DIM, OUTPUT_DIM)
    b2 = jax.random.normal(k_b2, (1, OUTPUT_DIM), dtype=jnp.float32) * 0.01

    adj = build_normalized_adjacency(NUM_NODES)            # [159, 159] f32

    # ---- pack / pad for the kernel ----
    adj_p = pad_to(adj, (N_PAD, N_PAD)).astype(jnp.bfloat16)
    x_p = pad_to(x, (BATCH, N_PAD, FIN_PAD))
    w1_p = pad_to(w1, (FIN_PAD, HIDDEN_DIM))
    b1_cat = jnp.tile(b1, (1, BATCH))                      # [1, HID_CAT]
    w2_bd = jnp.zeros((HID_CAT, OUT_CAT), jnp.float32)
    b2_cat = jnp.zeros((1, OUT_CAT), jnp.float32)
    for b in range(BATCH):
        w2_bd = w2_bd.at[b * HIDDEN_DIM:(b + 1) * HIDDEN_DIM,
                         b * OUT_PAD:b * OUT_PAD + OUTPUT_DIM].set(w2)
        b2_cat = b2_cat.at[0, b * OUT_PAD:b * OUT_PAD + OUTPUT_DIM].set(b2[0])
    w2_bd = w2_bd.astype(jnp.bfloat16)

    # ---- run the fused kernel (single grid-less step for the whole batch) ----
    out_cat = gnn_forward(adj_p, x_p, w1_p, b1_cat, w2_bd, b2_cat)   # [160, 128] bf16
    out = (out_cat.reshape(N_PAD, BATCH, OUT_PAD)
           .transpose(1, 0, 2)[:, :NUM_NODES, :OUTPUT_DIM]
           .astype(jnp.float32))                                     # [B, 159, 3]
    jax.block_until_ready(out)

    # --- check 1 (tight): plain-JAX emulation of the kernel's exact numerics ---
    xw = jnp.concatenate(
        [x_p[b, :, 0:1] * w1_p[0:1, :] + x_p[b, :, 1:2] * w1_p[1:2, :]
         for b in range(BATCH)], axis=1)                             # [160, 256] f32
    h_emu = jnp.maximum(
        jnp.dot(adj_p, xw.astype(jnp.bfloat16),
                preferred_element_type=jnp.float32) + b1_cat, 0.0)
    hw_emu = jnp.dot(h_emu.astype(jnp.bfloat16), w2_bd,
                     preferred_element_type=jnp.float32)
    o_emu = (jnp.dot(adj_p, hw_emu.astype(jnp.bfloat16),
                     preferred_element_type=jnp.float32) + b2_cat).astype(jnp.bfloat16)
    ref_emu = (o_emu.reshape(N_PAD, BATCH, OUT_PAD)
               .transpose(1, 0, 2)[:, :NUM_NODES, :OUTPUT_DIM].astype(jnp.float32))
    np.testing.assert_allclose(np.asarray(out), np.asarray(ref_emu),
                               rtol=2e-2, atol=2e-2)

    # --- check 2 (semantic, full f32): PyTorch-module forward semantics ---
    def f32_one(xb):                                     # xb: [NUM_NODES, INPUT_DIM]
        hh = jnp.maximum(adj @ (xb @ w1) + b1, 0.0)
        return adj @ (hh @ w2) + b2

    ref_f32 = jax.vmap(f32_one)(x)
    np.testing.assert_allclose(np.asarray(out), np.asarray(ref_f32),
                               rtol=5e-2, atol=5e-2)

    assert out.shape == (BATCH, NUM_NODES, OUTPUT_DIM)
    print("KERNEL_OK")
</pallas_src>

<mosaic_0001>
module attributes {stable_mosaic.version = 11 : i64} {
  func.func @gnn_kernel(%arg0: memref<160x160xbf16, #tpu.memory_space<vmem>>, %arg1: memref<4x160x8xf32, #tpu.memory_space<vmem>>, %arg2: memref<8x64xf32, #tpu.memory_space<vmem>>, %arg3: memref<1x256xf32, #tpu.memory_space<vmem>>, %arg4: memref<256x128xbf16, #tpu.memory_space<vmem>>, %arg5: memref<1x128xf32, #tpu.memory_space<vmem>>, %arg6: memref<160x128xbf16, #tpu.memory_space<vmem>>, %arg7: memref<160x256xf32, #tpu.memory_space<vmem>>) attributes {dimension_semantics = [], scalar_prefetch = 0 : i64, scratch_operands = 1 : i64, tpu.core_type = #tpu.core_type<tc>} {
    %c0 = arith.constant 0 : index
    %c0_0 = arith.constant 0 : index
    %0 = vector.load %arg2[%c0, %c0_0] : memref<8x64xf32, #tpu.memory_space<vmem>>, vector<1x64xf32>
    %c1 = arith.constant 1 : index
    %c0_1 = arith.constant 0 : index
    %1 = vector.load %arg2[%c1, %c0_1] : memref<8x64xf32, #tpu.memory_space<vmem>>, vector<1x64xf32>
    %c0_2 = arith.constant 0 : index
    %c0_3 = arith.constant 0 : index
    %c0_4 = arith.constant 0 : index
    %2 = vector.load %arg1[%c0_2, %c0_3, %c0_4] : memref<4x160x8xf32, #tpu.memory_space<vmem>>, vector<1x160x8xf32>
    %3 = vector.shape_cast %2 : vector<1x160x8xf32> to vector<160x8xf32>
    %4 = vector.extract_strided_slice %3 {offsets = [0, 0], sizes = [160, 1], strides = [1, 1]} : vector<160x8xf32> to vector<160x1xf32>
    %5 = vector.broadcast %4 : vector<160x1xf32> to vector<160x64xf32>
    %6 = vector.broadcast %0 : vector<1x64xf32> to vector<160x64xf32>
    %7 = arith.mulf %5, %6 : vector<160x64xf32>
    %8 = vector.extract_strided_slice %3 {offsets = [0, 1], sizes = [160, 1], strides = [1, 1]} : vector<160x8xf32> to vector<160x1xf32>
    %9 = vector.broadcast %8 : vector<160x1xf32> to vector<160x64xf32>
    %10 = vector.broadcast %1 : vector<1x64xf32> to vector<160x64xf32>
    %11 = arith.mulf %9, %10 : vector<160x64xf32>
    %12 = arith.addf %7, %11 : vector<160x64xf32>
    %c0_5 = arith.constant 0 : index
    %c0_6 = arith.constant 0 : index
    %13 = vector.load %arg7[%c0_5, %c0_6] : memref<160x256xf32, #tpu.memory_space<vmem>>, vector<160x64xf32>
    tpu.vector_store %arg7[%c0_5, %c0_6], %12 {strides = array<i32>} : memref<160x256xf32, #tpu.memory_space<vmem>>, vector<160x64xf32>,
    %c1_7 = arith.constant 1 : index
    %c0_8 = arith.constant 0 : index
    %c0_9 = arith.constant 0 : index
    %14 = vector.load %arg1[%c1_7, %c0_8, %c0_9] : memref<4x160x8xf32, #tpu.memory_space<vmem>>, vector<1x160x8xf32>
    %15 = vector.shape_cast %14 : vector<1x160x8xf32> to vector<160x8xf32>
    %16 = vector.extract_strided_slice %15 {offsets = [0, 0], sizes = [160, 1], strides = [1, 1]} : vector<160x8xf32> to vector<160x1xf32>
    %17 = vector.broadcast %16 : vector<160x1xf32> to vector<160x64xf32>
    %18 = vector.broadcast %0 : vector<1x64xf32> to vector<160x64xf32>
    %19 = arith.mulf %17, %18 : vector<160x64xf32>
    %20 = vector.extract_strided_slice %15 {offsets = [0, 1], sizes = [160, 1], strides = [1, 1]} : vector<160x8xf32> to vector<160x1xf32>
    %21 = vector.broadcast %20 : vector<160x1xf32> to vector<160x64xf32>
    %22 = vector.broadcast %1 : vector<1x64xf32> to vector<160x64xf32>
    %23 = arith.mulf %21, %22 : vector<160x64xf32>
    %24 = arith.addf %19, %23 : vector<160x64xf32>
    %c0_10 = arith.constant 0 : index
    %c64 = arith.constant 64 : index
    %25 = vector.load %arg7[%c0_10, %c64] : memref<160x256xf32, #tpu.memory_space<vmem>>, vector<160x64xf32>
    tpu.vector_store %arg7[%c0_10, %c64], %24 {strides = array<i32>} : memref<160x256xf32, #tpu.memory_space<vmem>>, vector<160x64xf32>,
    %c2 = arith.constant 2 : index
    %c0_11 = arith.constant 0 : index
    %c0_12 = arith.constant 0 : index
    %26 = vector.load %arg1[%c2, %c0_11, %c0_12] : memref<4x160x8xf32, #tpu.memory_space<vmem>>, vector<1x160x8xf32>
    %27 = vector.shape_cast %26 : vector<1x160x8xf32> to vector<160x8xf32>
    %28 = vector.extract_strided_slice %27 {offsets = [0, 0], sizes = [160, 1], strides = [1, 1]} : vector<160x8xf32> to vector<160x1xf32>
    %29 = vector.broadcast %28 : vector<160x1xf32> to vector<160x64xf32>
    %30 = vector.broadcast %0 : vector<1x64xf32> to vector<160x64xf32>
    %31 = arith.mulf %29, %30 : vector<160x64xf32>
    %32 = vector.extract_strided_slice %27 {offsets = [0, 1], sizes = [160, 1], strides = [1, 1]} : vector<160x8xf32> to vector<160x1xf32>
    %33 = vector.broadcast %32 : vector<160x1xf32> to vector<160x64xf32>
    %34 = vector.broadcast %1 : vector<1x64xf32> to vector<160x64xf32>
    %35 = arith.mulf %33, %34 : vector<160x64xf32>
    %36 = arith.addf %31, %35 : vector<160x64xf32>
    %c0_13 = arith.constant 0 : index
    %c128 = arith.constant 128 : index
    %37 = vector.load %arg7[%c0_13, %c128] : memref<160x256xf32, #tpu.memory_space<vmem>>, vector<160x64xf32>
    tpu.vector_store %arg7[%c0_13, %c128], %36 {strides = array<i32>} : memref<160x256xf32, #tpu.memory_space<vmem>>, vector<160x64xf32>,
    %c3 = arith.constant 3 : index
    %c0_14 = arith.constant 0 : index
    %c0_15 = arith.constant 0 : index
    %38 = vector.load %arg1[%c3, %c0_14, %c0_15] : memref<4x160x8xf32, #tpu.memory_space<vmem>>, vector<1x160x8xf32>
    %39 = vector.shape_cast %38 : vector<1x160x8xf32> to vector<160x8xf32>
    %40 = vector.extract_strided_slice %39 {offsets = [0, 0], sizes = [160, 1], strides = [1, 1]} : vector<160x8xf32> to vector<160x1xf32>
    %41 = vector.broadcast %40 : vector<160x1xf32> to vector<160x64xf32>
    %42 = vector.broadcast %0 : vector<1x64xf32> to vector<160x64xf32>
    %43 = arith.mulf %41, %42 : vector<160x64xf32>
    %44 = vector.extract_strided_slice %39 {offsets = [0, 1], sizes = [160, 1], strides = [1, 1]} : vector<160x8xf32> to vector<160x1xf32>
    %45 = vector.broadcast %44 : vector<160x1xf32> to vector<160x64xf32>
    %46 = vector.broadcast %1 : vector<1x64xf32> to vector<160x64xf32>
    %47 = arith.mulf %45, %46 : vector<160x64xf32>
    %48 = arith.addf %43, %47 : vector<160x64xf32>
    %c0_16 = arith.constant 0 : index
    %c192 = arith.constant 192 : index
    %49 = vector.load %arg7[%c0_16, %c192] : memref<160x256xf32, #tpu.memory_space<vmem>>, vector<160x64xf32>
    tpu.vector_store %arg7[%c0_16, %c192], %48 {strides = array<i32>} : memref<160x256xf32, #tpu.memory_space<vmem>>, vector<160x64xf32>,
    %c0_17 = arith.constant 0 : index
    %c0_18 = arith.constant 0 : index
    %50 = vector.load %arg0[%c0_17, %c0_18] : memref<160x160xbf16, #tpu.memory_space<vmem>>, vector<160x160xbf16>
    %c0_19 = arith.constant 0 : index
    %c0_20 = arith.constant 0 : index
    %51 = vector.load %arg7[%c0_19, %c0_20] : memref<160x256xf32, #tpu.memory_space<vmem>>, vector<160x256xf32>
    %52 = arith.truncf %51 : vector<160x256xf32> to vector<160x256xbf16>
    %cst = arith.constant dense<0.000000e+00> : vector<160x256xf32>
    %53 = tpu.matmul %50, %52, %cst {dimension_numbers = #tpu.dot_dimension_numbers<[1], [0], [0], [1], [0, 0, 1, 1], [], []>} : vector<160x160xbf16>, vector<160x256xbf16>, vector<160x256xf32> -> vector<160x256xf32>
    %c0_21 = arith.constant 0 : index
    %c0_22 = arith.constant 0 : index
    %54 = vector.load %arg3[%c0_21, %c0_22] : memref<1x256xf32, #tpu.memory_space<vmem>>, vector<1x256xf32>
    %55 = vector.broadcast %54 : vector<1x256xf32> to vector<160x256xf32>
    %56 = arith.addf %53, %55 : vector<160x256xf32>
    %cst_23 = arith.constant 0.000000e+00 : f32
    %57 = vector.broadcast %cst_23 : f32 to vector<160x256xf32>
    %58 = arith.maximumf %56, %57 : vector<160x256xf32>
    %59 = arith.truncf %58 : vector<160x256xf32> to vector<160x256xbf16>
    %c0_24 = arith.constant 0 : index
    %c0_25 = arith.constant 0 : index
    %60 = vector.load %arg4[%c0_24, %c0_25] : memref<256x128xbf16, #tpu.memory_space<vmem>>, vector<256x128xbf16>
    %cst_26 = arith.constant dense<0.000000e+00> : vector<160x128xf32>
    %61 = tpu.matmul %59, %60, %cst_26 {dimension_numbers = #tpu.dot_dimension_numbers<[1], [0], [0], [1], [0, 0, 1, 1], [], []>} : vector<160x256xbf16>, vector<256x128xbf16>, vector<160x128xf32> -> vector<160x128xf32>
    %c0_27 = arith.constant 0 : index
    %c0_28 = arith.constant 0 : index
    %62 = vector.load %arg0[%c0_27, %c0_28] : memref<160x160xbf16, #tpu.memory_space<vmem>>, vector<160x160xbf16>
    %63 = arith.truncf %61 : vector<160x128xf32> to vector<160x128xbf16>
    %cst_29 = arith.constant dense<0.000000e+00> : vector<160x128xf32>
    %64 = tpu.matmul %62, %63, %cst_29 {dimension_numbers = #tpu.dot_dimension_numbers<[1], [0], [0], [1], [0, 0, 1, 1], [], []>} : vector<160x160xbf16>, vector<160x128xbf16>, vector<160x128xf32> -> vector<160x128xf32>
    %c0_30 = arith.constant 0 : index
    %c0_31 = arith.constant 0 : index
    %65 = vector.load %arg5[%c0_30, %c0_31] : memref<1x128xf32, #tpu.memory_space<vmem>>, vector<1x128xf32>
    %66 = vector.broadcast %65 : vector<1x128xf32> to vector<160x128xf32>
    %67 = arith.addf %64, %66 : vector<160x128xf32>
    %68 = arith.truncf %67 : vector<160x128xf32> to vector<160x128xbf16>
    %c0_32 = arith.constant 0 : index
    %c0_33 = arith.constant 0 : index
    %69 = vector.load %arg6[%c0_32, %c0_33] : memref<160x128xbf16, #tpu.memory_space<vmem>>, vector<160x128xbf16>
    tpu.vector_store %arg6[%c0_32, %c0_33], %68 {strides = array<i32>} : memref<160x128xbf16, #tpu.memory_space<vmem>>, vector<160x128xbf16>,
    return
  }
}

</mosaic_0001>

<bundles_post_ra>
// kernel: tpu_custom_call.1
= control target key start
LH: loop header
LB: loop body
LE: loop exit
PB: predicated region body
PF: predicated region fallthrough
CT: control target
= control target key end

     0   :  { %v4136_v3 = vmov 0   ;;  %s4129_s0 = inlined_call_operand.vmem [shape: bf16[160,160], index: 0, kind: input, shape index: {}]   ;;  %s4130_s1 = inlined_call_operand.vmem [shape: f32[4,160,8], index: 1, kind: input, shape index: {}]   ;;  %s4131_s2 = inlined_call_operand.vmem [shape: f32[8,64], index: 2, kind: input, shape index: {}]   ;;  %s4132_s3 = inlined_call_operand.vmem [shape: f32[1,256], index: 3, kind: input, shape index: {}]   ;;  %s4133_s4 = inlined_call_operand.vmem [shape: bf16[256,128], index: 4, kind: input, shape index: {}]   ;;  %s4134_s5 = inlined_call_operand.vmem [shape: f32[1,128], index: 5, kind: input, shape index: {}]   ;;  %s4135_s6 = inlined_call_operand.hbm [shape: bf16[160,128], index: 6, kind: output, shape index: {}]  }
   0x1   :  { %v31_v0 = vld [vmem:[%s4130_s1 + $0x20] sm:$0xff]  ;;  %v29_v1 = vld [vmem:[%s4130_s1 + $0x10] sm:$0xff]  ;;  %2589 = vset.pattern.permute.xlu2 %v4136_v3  ;;  %2588 = vset.pattern.permute.xlu1 %v4136_v3 }
   0x2   :  { %v27_v2 = vld [vmem:[%s4130_s1] sm:$0xff]  ;;  %2587 = vset.pattern.permute.xlu0 %v4136_v3  ;;  %69 = vperm.xlu2 %2589, %v31_v0  }
   0x3   :  { %59 = vperm.xlu1 %2588, %v29_v1   ;;  %49 = vperm.xlu0 %2587, %v27_v2  }
   0x4   :  { %11 = vsyncpa [#allocation4], 0  ;;  %v32_v4 = vld [vmem:[%s4130_s1 + $0x28] sm:$0xff]  ;;  %v30_v5 = vld [vmem:[%s4130_s1 + $0x18] sm:$0xff]  ;;  %v4138_v21 = vmov 1   ;;  %vm289_vm0 = vcmask 523264  }
   0x5   :  { %v28_v6 = vld [vmem:[%s4130_s1 + $0x8] sm:$0xff]  ;;  %v35_v7 = vld [vmem:[%s4130_s1 + $0x40] sm:$0xff]  ;;  %v34_v8 = vld [vmem:[%s4130_s1 + $0x38] sm:$0xff]  ;;  %s2692_s7 = smov 64   ;;  %vm651_vm1 = vcmask 1048064   ;;  %vm1490_vm2 = vcmask 261120  }
   0x6   :  { %v33_v9 = vld [vmem:[%s4130_s1 + $0x30] sm:$0xff]  ;;  %v38_v10 = vld [vmem:[%s4130_s1 + $0x58] sm:$0xff]  ;;  %v36_v12 = vld [vmem:[%s4130_s1 + $0x48] sm:$0xff]  ;;  %s2241_s19 = sshll.u32 %s4135_s6, 4  ;;  %s2242_s19 = int_to_ptr.hbm [resolvable:$true] %s2241_s19 }
   0x7   :  { %v37_v11 = vld [vmem:[%s4130_s1 + $0x50] sm:$0xff]  ;;  %v40_v14 = vld [vmem:[%s4130_s1 + $0x68] sm:$0xff]  ;;  %v39_v15 = vld [vmem:[%s4130_s1 + $0x60] sm:$0xff] }
   0x8   :  { %v41_v13 = vld [vmem:[%s4130_s1 + $0x70] sm:$0xff]  ;;  %v44_v16 = vld [vmem:[%s4130_s1 + $0x88] sm:$0xff]  ;;  %v43_v17 = vld [vmem:[%s4130_s1 + $0x80] sm:$0xff] }
   0x9   :  { %v42_v18 = vld [vmem:[%s4130_s1 + $0x78] sm:$0xff]  ;;  %v45_v20 = vld [vmem:[%s4130_s1 + $0x90] sm:$0xff]  ;;  %v2306_v23 = vld [vmem:[%s4130_s1 + $0x248] sm:$0xff] }
   0xa   :  { %74 = vperm.xlu2 %2589, %v32_v4   ;;  %v46_v19 = vld [vmem:[%s4130_s1 + $0x98] sm:$0xff]  ;;  %v2307_v22 = vld [vmem:[%s4130_s1 + $0x250] sm:$0xff]  ;;  %v2807_v25 = vld [vmem:[%s4130_s1 + $0x220] sm:$0xff] }
   0xb   :  { %64 = vperm.xlu1 %2588, %v30_v5   ;;  %54 = vperm.xlu0 %2587, %v28_v6   ;;  %v2303_v24 = vld [vmem:[%s4130_s1 + $0x230] sm:$0xff]  ;;  %v2813_v26 = vld [vmem:[%s4130_s1 + $0x218] sm:$0xff]  ;;  %v2305_v31 = vld [vmem:[%s4130_s1 + $0x240] sm:$0xff] }
   0xc   :  { %v2308_v29 = vld [vmem:[%s4130_s1 + $0x258] sm:$0xff]  ;;  %v2854_v42 = vld [vmem:[%s4131_s2] ss:$0 sm:$0xff]  ;;  %v2267_v43 = vld [vmem:[%s4130_s1 + $0x110] sm:$0xff] }
   0xd   :  { %v2304_v39 = vld [vmem:[%s4130_s1 + $0x238] sm:$0xff]  ;;  %v2865_v46 = vld [vmem:[%s4131_s2 + $0x1] ss:$0 sm:$0xff]  ;;  %v2302_v52 = vld [vmem:[%s4130_s1 + $0x228] sm:$0xff] }
   0xe   :  { %v2268_v48 = vld [vmem:[%s4130_s1 + $0x118] sm:$0xff]  ;;  %v2265_v59 = vld [vmem:[%s4130_s1 + $0x100] sm:$0xff] }
  0x12   :  { %89 = vperm.xlu2 %2589, %v35_v7  }
  0x13   :  { %84 = vperm.xlu1 %2588, %v34_v8   ;;  %79 = vperm.xlu0 %2587, %v33_v9  }
  0x1a   :  { %104 = vperm.xlu2 %2589, %v38_v10  }
  0x1b   :  { %99 = vperm.xlu1 %2588, %v37_v11   ;;  %94 = vperm.xlu0 %2587, %v36_v12  }
  0x22   :  { %119 = vperm.xlu2 %2589, %v41_v13  }
  0x23   :  { %114 = vperm.xlu1 %2588, %v40_v14   ;;  %109 = vperm.xlu0 %2587, %v39_v15  }
  0x2a   :  { %134 = vperm.xlu2 %2589, %v44_v16  }
  0x2b   :  { %129 = vperm.xlu1 %2588, %v43_v17   ;;  %124 = vperm.xlu0 %2587, %v42_v18  }
  0x32   :  { %2590 = vset.pattern.permute.xlu2 %v4138_v21 }
  0x33   :  { %144 = vperm.xlu1 %2588, %v46_v19   ;;  %139 = vperm.xlu0 %2587, %v45_v20  }
  0x34   :  { %169 = vperm.xlu2 %2590, %v27_v2  }
  0x3b   :  { %2591 = vset.pattern.permute.xlu1 %v4138_v21  ;;  %1046 = vperm.xlu0 %2587, %v2307_v22  }
  0x3c   :  { %177 = vperm.xlu1 %2591, %v29_v1   ;;  %181 = vperm.xlu2 %2590, %v30_v5   ;;  %v2311_v1 = vld [vmem:[%s4130_s1 + $0x270] sm:$0xff] }
  0x43   :  { %1041 = vperm.xlu0 %2587, %v2306_v23  }
  0x44   :  { %185 = vperm.xlu1 %2591, %v31_v0   ;;  %189 = vperm.xlu2 %2590, %v32_v4   ;;  %v2905_v4 = vld [vmem:[%s4130_s1 + $0x260] sm:$0xff] }
  0x4b   :  { %1026 = vperm.xlu0 %2587, %v2303_v24  }
  0x4c   :  { %197 = vperm.xlu1 %2591, %v34_v8   ;;  %201 = vperm.xlu2 %2590, %v35_v7   ;;  %v2312_v8 = vld [vmem:[%s4130_s1 + $0x278] sm:$0xff] }
  0x53   :  { %1016 = vperm.xlu0 %2587, %v2807_v25  }
  0x54   :  { %209 = vperm.xlu1 %2591, %v37_v11   ;;  %213 = vperm.xlu2 %2590, %v38_v10  }
  0x5b   :  { %1011 = vperm.xlu0 %2587, %v2813_v26  }
  0x5c   :  { %221 = vperm.xlu1 %2591, %v40_v14   ;;  %225 = vperm.xlu2 %2590, %v41_v13   ;;  %v2816_v27 = vpop.permute.xlu2 %69 }
  0x63   :  { %2607 = vset.pattern.permute.xlu0 %v4138_v21 }
  0x64   :  { %233 = vperm.xlu1 %2591, %v43_v17   ;;  %237 = vperm.xlu2 %2590, %v44_v16   ;;  %v2819_v28 = vpop.permute.xlu2 %74 }
  0x65   :  { %173 = vperm.xlu0 %2607, %v28_v6   ;;  %v153_v63 = vmul.f32 %v2854_v42, %v2819_v28 }
  0x6c   :  { %2592 = vset.pattern.permute.xlu1 %v4136_v3  ;;  %1151 = vperm.xlu2 %2590, %v2307_v22   ;;  %v2825_v30 = vpop.permute.xlu2 %89 }
  0x6d   :  { %193 = vperm.xlu0 %2607, %v33_v9   ;;  %1051 = vperm.xlu1 %2592, %v2308_v29   ;;  %v156_v9 = vmul.f32 %v2854_v42, %v2825_v30 }
  0x74   :  { %2594 = vset.pattern.permute.xlu2 %v4136_v3  ;;  %v2831_v32 = vpop.permute.xlu2 %104 }
  0x75   :  { %205 = vperm.xlu0 %2607, %v36_v12   ;;  %2593 = vset.pattern.permute.xlu1 %v4138_v21  ;;  %v2834_v33 = vpop.permute.xlu1 %59  ;;  %v50_v34 = vpop.permute.xlu0 %49  ;;  %v2923_v12 = vld [vmem:[%s4130_s1 + $0x138] sm:$0xff]  ;;  %v159_v16 = vmul.f32 %v2854_v42, %v2831_v32 }
  0x76   :  { %1036 = vperm.xlu2 %2594, %v2305_v31   ;;  %1155 = vperm.xlu1 %2593, %v2308_v29   ;;  %v148_v44 = vmul.f32 %v2854_v42, %v50_v34  ;;  %v150_v17 = vmul.f32 %v2854_v42, %v2834_v33  ;;  %v152_v29 = vmul.f32 %v2854_v42, %v2816_v27 }
  0x7c   :  { %v2836_v35 = vpop.permute.xlu2 %119 }
  0x7d   :  { %217 = vperm.xlu0 %2607, %v39_v15   ;;  %v65_v36 = vpop.permute.xlu1 %64  ;;  %v2838_v37 = vpop.permute.xlu0 %54  ;;  %v162_v30 = vmul.f32 %v2854_v42, %v2836_v35 }
  0x7e   :  { %2595 = vset.pattern.permute.xlu2 %v4138_v21  ;;  %1143 = vperm.xlu1 %2593, %v2305_v31   ;;  %v151_v56 = vmul.f32 %v2854_v42, %v65_v36  ;;  %v2266_v36 = vld [vmem:[%s4130_s1 + $0x108] sm:$0xff] }
  0x7f   :  { %1147 = vperm.xlu2 %2595, %v2306_v23   ;;  %v2940_v23 = vld [vmem:[%s4130_s1 + $0xf0] sm:$0xff] }
  0x84   :  { %v2841_v38 = vpop.permute.xlu2 %134 }
  0x85   :  { %229 = vperm.xlu0 %2607, %v42_v18   ;;  %v2846_v40 = vpop.permute.xlu1 %84  ;;  %v2848_v41 = vpop.permute.xlu0 %79 }
  0x86   :  { %2596 = vset.pattern.permute.xlu1 %v4136_v3 }
  0x87   :  { %1135 = vperm.xlu2 %2595, %v2303_v24   ;;  %1031 = vperm.xlu1 %2596, %v2304_v39  }
  0x8d   :  { %1139 = vperm.xlu0 %2607, %v2304_v39   ;;  %v2860_v45 = vpop.permute.xlu1 %99  ;;  %v2867_v47 = vpop.permute.xlu0 %94  ;;  %v2960_v39 = vld [vmem:[%s4130_s1 + $0x120] sm:$0xff] }
  0x8e   :  { %v170_v49 = vpop.permute.xlu2 %169 }
  0x8f   :  { %2597 = vset.pattern.permute.xlu2 %v4136_v3  ;;  %v249_v50 = vmul.f32 %v2865_v46, %v170_v49  ;;  %403 = vperm.xlu1 %2596, %v2267_v43  }
  0x90   :  { %408 = vperm.xlu2 %2597, %v2268_v48  }
  0x91   :  { %v269_v51 = vadd.f32 %v249_v50, %v148_v44  ;;  %v165_v44 = vmul.f32 %v2854_v42, %v2841_v38 }
  0x93   :  { %290 = vst.msk [vmem:[#allocation2] sm:$0xff] %vm289_vm0, %v269_v51 }
  0x95   :  { %1131 = vperm.xlu0 %2607, %v2302_v52   ;;  %v2878_v53 = vpop.permute.xlu1 %114  ;;  %v2880_v54 = vpop.permute.xlu0 %109 }
  0x96   :  { %v182_v55 = vpop.permute.xlu2 %181 }
  0x97   :  { %v252_v57 = vmul.f32 %v2865_v46, %v182_v55  ;;  %2598 = vset.pattern.permute.xlu1 %v4138_v21  ;;  %v2299_v55 = vld [vmem:[%s4130_s1 + $0x210] sm:$0xff] }
  0x98   :  { %2599 = vset.pattern.permute.xlu2 %v4138_v21  ;;  %508 = vperm.xlu1 %2598, %v2267_v43  }
  0x99   :  { %v272_v58 = vadd.f32 %v252_v57, %v151_v56  ;;  %512 = vperm.xlu2 %2599, %v2268_v48   ;;  %v155_v48 = vmul.f32 %v2854_v42, %v2846_v40  ;;  %v2980_v56 = vld [vmem:[%s4130_s1 + $0xe8] sm:$0xff]  ;;  %v158_v57 = vmul.f32 %v2854_v42, %v2860_v45 }
  0x9b   :  { %293 = vst.msk [vmem:[#allocation2 + $0x30] sm:$0xff] %vm289_vm0, %v272_v58 }
  0x9d   :  { %500 = vperm.xlu0 %2607, %v2265_v59   ;;  %v2890_v60 = vpop.permute.xlu1 %129  ;;  %v2892_v61 = vpop.permute.xlu0 %124 }
  0x9e   :  { %v190_v62 = vpop.permute.xlu2 %189 }
  0x9f   :  { %v254_v0 = vmul.f32 %v2865_v46, %v190_v62 }
  0xa0   :  { %2600 = vset.pattern.permute.xlu1 %v4136_v3 }
  0xa1   :  { %v274_v2 = vadd.f32 %v254_v0, %v153_v63  ;;  %2601 = vset.pattern.permute.xlu2 %v4136_v3  ;;  %1021 = vperm.xlu1 %2600, %v2302_v52   ;;  %v2310_v63 = vld [vmem:[%s4130_s1 + $0x268] sm:$0xff]  ;;  %v2999_v0 = vld [vmem:[%s4130_s1 + $0x1f0] sm:$0xff] }
  0xa2   :  { %1066 = vperm.xlu2 %2601, %v2311_v1  }
  0xa3   :  { %295 = vst.msk [vmem:[#allocation2 + $0x50] sm:$0xff] %vm289_vm0, %v274_v2  ;;  %v161_v2 = vmul.f32 %v2854_v42, %v2878_v53  ;;  %v149_v53 = vmul.f32 %v2854_v42, %v2838_v37  ;;  %v2271_v37 = vld [vmem:[%s4130_s1 + $0x130] sm:$0xff] }
  0xa5   :  { %1159 = vperm.xlu0 %2607, %v2905_v4   ;;  %v2909_v5 = vpop.permute.xlu1 %144  ;;  %v2911_v6 = vpop.permute.xlu0 %139 }
  0xa6   :  { %4140 = vst [vmem:[#allocation6_spill] sm:$0xff] %v2911_v6  ;;  %v202_v7 = vpop.permute.xlu2 %201 }
  0xa7   :  { %v257_v10 = vmul.f32 %v2865_v46, %v202_v7 }
  0xa9   :  { %v277_v11 = vadd.f32 %v257_v10, %v156_v9  ;;  %1071 = vperm.xlu1 %2600, %v2312_v8   ;;  %v3015_v10 = vld [vmem:[%s4130_s1 + $0x1e0] sm:$0xff] }
  0xaa   :  { %2602 = vset.pattern.permute.xlu2 %v4138_v21 }
  0xab   :  { %1127 = vperm.xlu2 %2602, %v2807_v25   ;;  %298 = vst.msk [vmem:[#allocation2 + $0x80] sm:$0xff] %vm289_vm0, %v277_v11  ;;  %v164_v11 = vmul.f32 %v2854_v42, %v2890_v60  ;;  %v154_v60 = vmul.f32 %v2854_v42, %v2848_v41  ;;  %v157_v41 = vmul.f32 %v2854_v42, %v2867_v47  ;;  %v2264_v47 = vld [vmem:[%s4130_s1 + $0xf8] sm:$0xff] }
  0xad   :  { %528 = vperm.xlu0 %2607, %v2923_v12   ;;  %v2928_v13 = vpop.permute.xlu0 %1046 }
  0xae   :  { %v178_v14 = vpop.permute.xlu1 %177  ;;  %v214_v15 = vpop.permute.xlu2 %213 }
  0xaf   :  { %v251_v18 = vmul.f32 %v2865_v46, %v178_v14  ;;  %v260_v19 = vmul.f32 %v2865_v46, %v214_v15 }
  0xb1   :  { %v271_v20 = vadd.f32 %v251_v18, %v150_v17  ;;  %v280_v22 = vadd.f32 %v260_v19, %v159_v16  ;;  %2603 = vset.pattern.permute.xlu1 %v4138_v21  ;;  %v3031_v19 = vld [vmem:[%s4130_s1 + $0xc8] sm:$0xff] }
  0xb2   :  { %1167 = vperm.xlu1 %2603, %v2311_v1  }
  0xb3   :  { %1171 = vperm.xlu2 %2602, %v2312_v8   ;;  %292 = vst.msk [vmem:[#allocation2 + $0x20] sm:$0xff] %vm289_vm0, %v271_v20 }
  0xb4   :  { %301 = vst.msk [vmem:[#allocation2 + $0xb0] sm:$0xff] %vm289_vm0, %v280_v22 }
  0xb5   :  { %492 = vperm.xlu0 %2607, %v2940_v23   ;;  %v2945_v24 = vpop.permute.xlu0 %1041 }
  0xb6   :  { %v186_v25 = vpop.permute.xlu1 %185  ;;  %v226_v28 = vpop.permute.xlu2 %225 }
  0xb7   :  { %v253_v31 = vmul.f32 %v2865_v46, %v186_v25  ;;  %v263_v32 = vmul.f32 %v2865_v46, %v226_v28 }
  0xb9   :  { %v273_v33 = vadd.f32 %v253_v31, %v152_v29  ;;  %v283_v34 = vadd.f32 %v263_v32, %v162_v30  ;;  %v3050_v30 = vld [vmem:[%s4130_s1 + $0xb0] sm:$0xff] }
  0xba   :  { %2604 = vset.pattern.permute.xlu1 %v4136_v3 }
  0xbb   :  { %2605 = vset.pattern.permute.xlu2 %v4136_v3  ;;  %393 = vperm.xlu1 %2604, %v2265_v59   ;;  %294 = vst.msk [vmem:[#allocation2 + $0x40] sm:$0xff] %vm289_vm0, %v273_v33 }
  0xbc   :  { %398 = vperm.xlu2 %2605, %v2266_v36   ;;  %304 = vst.msk [vmem:[#allocation2 + $0xe0] sm:$0xff] %vm289_vm0, %v283_v34 }
  0xbd   :  { %516 = vperm.xlu0 %2607, %v2960_v39   ;;  %v2966_v27 = vpop.permute.xlu0 %1026 }
  0xbe   :  { %v198_v35 = vpop.permute.xlu1 %197  ;;  %v238_v43 = vpop.permute.xlu2 %237 }
  0xbf   :  { %v256_v49 = vmul.f32 %v2865_v46, %v198_v35  ;;  %v266_v50 = vmul.f32 %v2865_v46, %v238_v43  ;;  %v3067_v35 = vld [vmem:[%s4130_s1 + $0xa0] sm:$0xff] }
  0xc1   :  { %v276_v51 = vadd.f32 %v256_v49, %v155_v48  ;;  %v286_v52 = vadd.f32 %v266_v50, %v165_v44  ;;  %v3084_v50 = vld [vmem:[%s4130_s1 + $0x1a8] sm:$0xff] }
  0xc3   :  { %2606 = vset.pattern.permute.xlu1 %v4138_v21  ;;  %297 = vst.msk [vmem:[#allocation2 + $0x70] sm:$0xff] %vm289_vm0, %v276_v51 }
  0xc4   :  { %1006 = vperm.xlu2 %2605, %v2299_v55   ;;  %504 = vperm.xlu1 %2606, %v2266_v36   ;;  %307 = vst.msk [vmem:[#allocation2 + $0x110] sm:$0xff] %vm289_vm0, %v286_v52 }
  0xc5   :  { %488 = vperm.xlu0 %2607, %v2980_v56   ;;  %v2986_v38 = vpop.permute.xlu0 %1016 }
  0xc6   :  { %v210_v40 = vpop.permute.xlu1 %209  ;;  %v2991_v59 = vpop.permute.xlu2 %1151 }
  0xc7   :  { %v259_v58 = vmul.f32 %v2865_v46, %v210_v40  ;;  %v163_v40 = vmul.f32 %v2854_v42, %v2892_v61  ;;  %v3109_v61 = vld [vmem:[%s4130_s1 + $0x208] sm:$0xff] }
  0xc9   :  { %v279_v62 = vadd.f32 %v259_v58, %v158_v57 }
  0xcb   :  { %300 = vst.msk [vmem:[#allocation2 + $0xa0] sm:$0xff] %vm289_vm0, %v279_v62 }
  0xcc   :  { %1061 = vperm.xlu2 %2605, %v2310_v63   ;;  %2608 = vset.pattern.permute.xlu1 %v4136_v3 }
  0xcd   :  { %1103 = vperm.xlu0 %2607, %v2999_v0   ;;  %1056 = vperm.xlu1 %2608, %v2905_v4   ;;  %v3005_v45 = vpop.permute.xlu0 %1011 }
  0xce   :  { %v222_v1 = vpop.permute.xlu1 %221 }
  0xcf   :  { %v262_v7 = vmul.f32 %v2865_v46, %v222_v1 }
  0xd0   :  { %v3010_v8 = vpop.permute.xlu2 %1036 }
  0xd1   :  { %v282_v9 = vadd.f32 %v262_v7, %v161_v2  ;;  %v3120_v7 = vld [vmem:[%s4130_s1 + $0x188] sm:$0xff] }
  0xd3   :  { %303 = vst.msk [vmem:[#allocation2 + $0xd0] sm:$0xff] %vm289_vm0, %v282_v9 }
  0xd4   :  { %2610 = vset.pattern.permute.xlu2 %v4138_v21 }
  0xd5   :  { %1123 = vperm.xlu2 %2610, %v2813_v26   ;;  %1095 = vperm.xlu0 %2607, %v3015_v10  }
  0xd6   :  { %2609 = vset.pattern.permute.xlu1 %v4138_v21  ;;  %v234_v4 = vpop.permute.xlu1 %233 }
  0xd7   :  { %1119 = vperm.xlu1 %2609, %v2299_v55   ;;  %v265_v14 = vmul.f32 %v2865_v46, %v234_v4  ;;  %v174_v15 = vpop.permute.xlu0 %173  ;;  %v2270_v4 = vld [vmem:[%s4130_s1 + $0x128] sm:$0xff] }
  0xd8   :  { %v250_v16 = vmul.f32 %v2865_v46, %v174_v15 }
  0xd9   :  { %v285_v17 = vadd.f32 %v265_v14, %v164_v11  ;;  %v1148_v18 = vpop.permute.xlu2 %1147  ;;  %v3136_v14 = vld [vmem:[%s4130_s1 + $0x178] sm:$0xff] }
  0xda   :  { %v270_v26 = vadd.f32 %v250_v16, %v149_v53  ;;  %v1187_v52 = vmul.f32 %v2865_v46, %v1148_v18  ;;  %v2261_v18 = vld [vmem:[%s4130_s1 + $0xe0] sm:$0xff] }
  0xdb   :  { %306 = vst.msk [vmem:[#allocation2 + $0x100] sm:$0xff] %vm289_vm0, %v285_v17 }
  0xdc   :  { %291 = vst.msk [vmem:[#allocation2 + $0x10] sm:$0xff] %vm289_vm0, %v270_v26 }
  0xdd   :  { %2611 = vset.pattern.permute.xlu2 %v4136_v3  ;;  %472 = vperm.xlu0 %2607, %v3031_v19  }
  0xde   :  { %423 = vperm.xlu2 %2611, %v2271_v37  }
  0xdf   :  { %1163 = vperm.xlu1 %2609, %v2310_v63   ;;  %v194_v20 = vpop.permute.xlu0 %193  ;;  %v3042_v22 = vpop.permute.xlu1 %1051 }
  0xe0   :  { %v255_v25 = vmul.f32 %v2865_v46, %v194_v20 }
  0xe1   :  { %v3045_v28 = vpop.permute.xlu2 %1135 }
  0xe2   :  { %v275_v29 = vadd.f32 %v255_v25, %v154_v60 }
  0xe4   :  { %296 = vst.msk [vmem:[#allocation2 + $0x60] sm:$0xff] %vm289_vm0, %v275_v29 }
  0xe5   :  { %460 = vperm.xlu0 %2607, %v3050_v30  }
  0xe6   :  { %2613 = vset.pattern.permute.xlu2 %v4138_v21 }
  0xe7   :  { %2612 = vset.pattern.permute.xlu1 %v4136_v3  ;;  %524 = vperm.xlu2 %2613, %v2271_v37   ;;  %v206_v31 = vpop.permute.xlu0 %205 }
  0xe8   :  { %v258_v32 = vmul.f32 %v2865_v46, %v206_v31  ;;  %428 = vperm.xlu1 %2612, %v2923_v12   ;;  %v3060_v33 = vpop.permute.xlu1 %1155  ;;  %v160_v12 = vmul.f32 %v2854_v42, %v2880_v54  ;;  %v2297_v54 = vld [vmem:[%s4130_s1 + $0x200] sm:$0xff] }
  0xea   :  { %v278_v34 = vadd.f32 %v258_v32, %v157_v41  ;;  %v3062_v36 = vpop.permute.xlu2 %408 }
  0xec   :  { %299 = vst.msk [vmem:[#allocation2 + $0x90] sm:$0xff] %vm289_vm0, %v278_v34  ;;  %v2296_v34 = vld [vmem:[%s4130_s1 + $0x1f8] sm:$0xff] }
  0xed   :  { %452 = vperm.xlu0 %2607, %v3067_v35  }
  0xef   :  { %2614 = vset.pattern.permute.xlu2 %v4136_v3  ;;  %v218_v43 = vpop.permute.xlu0 %217 }
  0xf0   :  { %v261_v44 = vmul.f32 %v2865_v46, %v218_v43  ;;  %383 = vperm.xlu1 %2612, %v2940_v23   ;;  %388 = vperm.xlu2 %2614, %v2264_v47   ;;  %v3079_v48 = vpop.permute.xlu1 %1143  ;;  %v1087_v23 = vmul.f32 %v2854_v42, %v2945_v24  ;;  %v2259_v43 = vld [vmem:[%s4130_s1 + $0xd0] sm:$0xff] }
  0xf2   :  { %v281_v49 = vadd.f32 %v261_v44, %v160_v12  ;;  %v1207_v63 = vadd.f32 %v1187_v52, %v1087_v23 }
  0xf3   :  { %v3086_v51 = vpop.permute.xlu2 %512 }
  0xf4   :  { %302 = vst.msk [vmem:[#allocation2 + $0xc0] sm:$0xff] %vm289_vm0, %v281_v49 }
  0xf5   :  { %866 = vperm.xlu0 %2607, %v3084_v50  }
  0xf7   :  { %v230_v55 = vpop.permute.xlu0 %229 }
  0xf8   :  { %v264_v57 = vmul.f32 %v2865_v46, %v230_v55  ;;  %2615 = vset.pattern.permute.xlu1 %v4138_v21  ;;  %996 = vperm.xlu2 %2614, %v2297_v54   ;;  %v3186_v55 = vld [vmem:[%s4130_s1 + $0xd8] sm:$0xff] }
  0xf9   :  { %496 = vperm.xlu1 %2615, %v2264_v47   ;;  %v3100_v58 = vpop.permute.xlu1 %1031 }
  0xfa   :  { %v284_v62 = vadd.f32 %v264_v57, %v163_v40 }
  0xfc   :  { %v3102_v1 = vpop.permute.xlu2 %1066  ;;  %305 = vst.msk [vmem:[#allocation2 + $0xf0] sm:$0xff] %vm289_vm0, %v284_v62 }
  0xfd   :  { %1260 = vrot.lane.b32.xlu0 %v1207_v63, %s2692_s7 }
  0xff   :  { %v3111_v24 = vpop.permute.xlu0 %1139 }
 0x100   :  { %2616 = vset.pattern.permute.xlu2 %v4138_v21 }
 0x101   :  { %1111 = vperm.xlu1 %2615, %v2297_v54   ;;  %1115 = vperm.xlu2 %2616, %v3109_v61   ;;  %v3115_v2 = vpop.permute.xlu1 %403 }
 0x105   :  { %v1128_v9 = vpop.permute.xlu2 %1127  ;;  %850 = vperm.xlu0 %2607, %v3120_v7  }
 0x106   :  { %v1182_v16 = vmul.f32 %v2865_v46, %v1128_v9 }
 0x107   :  { %v3123_v53 = vpop.permute.xlu0 %1131 }
 0x109   :  { %2617 = vset.pattern.permute.xlu1 %v4136_v3  ;;  %2618 = vset.pattern.permute.xlu2 %v4136_v3 }
 0x10a   :  { %413 = vperm.xlu1 %2617, %v2960_v39   ;;  %418 = vperm.xlu2 %2618, %v2270_v4   ;;  %v3131_v11 = vpop.permute.xlu1 %508  ;;  %v1082_v39 = vmul.f32 %v2854_v42, %v2986_v38 }
 0x10c   :  { %v1202_v26 = vadd.f32 %v1182_v16, %v1082_v39 }
 0x10d   :  { %842 = vperm.xlu0 %2607, %v3136_v14   ;;  %v1172_v15 = vpop.permute.xlu2 %1171 }
 0x10e   :  { %v1193_v25 = vmul.f32 %v2865_v46, %v1172_v15 }
 0x10f   :  { %v3140_v17 = vpop.permute.xlu0 %500 }
 0x112   :  { %2619 = vset.pattern.permute.xlu1 %v4138_v21  ;;  %373 = vperm.xlu2 %2618, %v2261_v18  }
 0x113   :  { %520 = vperm.xlu1 %2619, %v2270_v4   ;;  %v3148_v37 = vpop.permute.xlu1 %1021  ;;  %v2294_v4 = vld [vmem:[%s4130_s1 + $0x1e8] sm:$0xff] }
 0x115   :  { %1250 = vrot.lane.b32.xlu0 %v1202_v26, %s2692_s7 }
 0x116   :  { %v399_v60 = vpop.permute.xlu2 %398 }
 0x117   :  { %v1160_v20 = vpop.permute.xlu0 %1159  ;;  %v444_v40 = vmul.f32 %v2854_v42, %v399_v60 }
 0x118   :  { %v1190_v15 = vmul.f32 %v2865_v46, %v1160_v20 }
 0x11a   :  { %2621 = vset.pattern.permute.xlu2 %v4138_v21 }
 0x11b   :  { %2620 = vset.pattern.permute.xlu1 %v4136_v3  ;;  %484 = vperm.xlu2 %2621, %v2261_v18   ;;  %v1072_v29 = vpop.permute.xlu1 %1071 }
 0x11c   :  { %378 = vperm.xlu1 %2620, %v2980_v56   ;;  %v1093_v38 = vmul.f32 %v2854_v42, %v1072_v29 }
 0x11e   :  { %v1213_v41 = vadd.f32 %v1193_v25, %v1093_v38  ;;  %v3156_v31 = vpop.permute.xlu2 %1006  ;;  %v2257_v38 = vld [vmem:[%s4130_s1 + $0xc0] sm:$0xff] }
 0x11f   :  { %v3158_v32 = vpop.permute.xlu0 %528 }
 0x120   :  { %1272 = vrot.lane.b32.xlu0 %v1213_v41, %s2692_s7 }
 0x123   :  { %2622 = vset.pattern.permute.xlu2 %v4136_v3 }
 0x124   :  { %986 = vperm.xlu1 %2620, %v2999_v0   ;;  %991 = vperm.xlu2 %2622, %v2296_v34   ;;  %v3166_v47 = vpop.permute.xlu1 %1167  ;;  %v1081_v0 = vmul.f32 %v2854_v42, %v3005_v45 }
 0x126   :  { %v1062_v56 = vpop.permute.xlu2 %1061 }
 0x127   :  { %v3168_v12 = vpop.permute.xlu0 %492 }
 0x12c   :  { %2623 = vset.pattern.permute.xlu1 %v4138_v21  ;;  %363 = vperm.xlu2 %2622, %v2259_v43  }
 0x12d   :  { %1107 = vperm.xlu1 %2623, %v2296_v34   ;;  %v3174_v44 = vpop.permute.xlu1 %393 }
 0x12f   :  { %v1124_v49 = vpop.permute.xlu2 %1123  ;;  %v3176_v54 = vpop.permute.xlu0 %516 }
 0x130   :  { %v1181_v23 = vmul.f32 %v2865_v46, %v1124_v49  ;;  %v1091_v49 = vmul.f32 %v2854_v42, %v1062_v56  ;;  %v550_v56 = vmul.f32 %v2865_v46, %v3158_v32  ;;  %v541_v32 = vmul.f32 %v2865_v46, %v3168_v12 }
 0x132   :  { %v3181_v52 = vadd.f32 %v1181_v23, %v1081_v0 }
 0x134   :  { %2624 = vset.pattern.permute.xlu2 %v4138_v21 }
 0x135   :  { %476 = vperm.xlu1 %2623, %v2259_v43   ;;  %480 = vperm.xlu2 %2624, %v3186_v55  }
 0x136   :  { %v505_v57 = vpop.permute.xlu1 %504 }
 0x137   :  { %v544_v62 = vmul.f32 %v2865_v46, %v505_v57  ;;  %v3192_v9 = vpop.permute.xlu0 %488  ;;  %v2256_v57 = vld [vmem:[%s4130_s1 + $0xb8] sm:$0xff] }
 0x138   :  { %v424_v45 = vpop.permute.xlu2 %423 }
 0x139   :  { %v564_v63 = vadd.f32 %v544_v62, %v444_v40  ;;  %v449_v39 = vmul.f32 %v2854_v42, %v424_v45 }
 0x13b   :  { %617 = vrot.lane.b32.xlu0 %v564_v63, %s2692_s7 }
 0x13d   :  { %2625 = vset.pattern.permute.xlu1 %v4136_v3  ;;  %2626 = vset.pattern.permute.xlu2 %v4136_v3 }
 0x13e   :  { %976 = vperm.xlu1 %2625, %v3015_v10   ;;  %981 = vperm.xlu2 %2626, %v2294_v4  }
 0x13f   :  { %v1057_v16 = vpop.permute.xlu1 %1056  ;;  %v3205_v29 = vpop.permute.xlu0 %1103 }
 0x140   :  { %v1090_v18 = vmul.f32 %v2854_v42, %v1057_v16 }
 0x141   :  { %v525_v26 = vpop.permute.xlu2 %524 }
 0x142   :  { %v1210_v60 = vadd.f32 %v1190_v15, %v1090_v18  ;;  %v549_v25 = vmul.f32 %v2865_v46, %v525_v26  ;;  %v2287_v15 = vld [vmem:[%s4130_s1 + $0x1b0] sm:$0xff] }
 0x144   :  { %1266 = vrot.lane.b32.xlu0 %v1210_v60, %s2692_s7  ;;  %v3211_v20 = vadd.f32 %v549_v25, %v449_v39  ;;  %v3250_v39 = vld [vmem:[%s4130_s1 + $0x150] sm:$0xff]  ;;  %v2288_v25 = vld [vmem:[%s4130_s1 + $0x1b8] sm:$0xff] }
 0x146   :  { %2627 = vset.pattern.permute.xlu1 %v4138_v21  ;;  %353 = vperm.xlu2 %2626, %v2257_v38  }
 0x147   :  { %1099 = vperm.xlu1 %2627, %v2294_v4   ;;  %v3216_v34 = vpop.permute.xlu0 %1095 }
 0x149   :  { %v3214_v10 = vpop.permute.xlu1 %1119 }
 0x14a   :  { %v389_v41 = vpop.permute.xlu2 %388 }
 0x14b   :  { %v442_v12 = vmul.f32 %v2854_v42, %v389_v41 }
 0x14e   :  { %2629 = vset.pattern.permute.xlu2 %v4138_v21 }
 0x14f   :  { %2628 = vset.pattern.permute.xlu1 %v4136_v3  ;;  %468 = vperm.xlu2 %2629, %v2257_v38   ;;  %v3228_v62 = vpop.permute.xlu0 %472 }
 0x150   :  { %358 = vperm.xlu1 %2628, %v3031_v19  }
 0x151   :  { %v1164_v43 = vpop.permute.xlu1 %1163 }
 0x152   :  { %v1191_v0 = vmul.f32 %v2865_v46, %v1164_v43  ;;  %v997_v23 = vpop.permute.xlu2 %996 }
 0x154   :  { %v3223_v40 = vadd.f32 %v1191_v0, %v1091_v49 }
 0x157   :  { %2630 = vset.pattern.permute.xlu2 %v4136_v3 }
 0x158   :  { %343 = vperm.xlu1 %2628, %v3050_v30   ;;  %348 = vperm.xlu2 %2630, %v2256_v57   ;;  %v3242_v30 = vpop.permute.xlu0 %460 }
 0x15a   :  { %v429_v19 = vpop.permute.xlu1 %428 }
 0x15b   :  { %v450_v45 = vmul.f32 %v2854_v42, %v429_v19  ;;  %v3235_v63 = vpop.permute.xlu2 %1115  ;;  %v2254_v19 = vld [vmem:[%s4130_s1 + $0xa8] sm:$0xff] }
 0x15d   :  { %v570_v4 = vadd.f32 %v550_v56, %v450_v45  ;;  %v1078_v56 = vmul.f32 %v2854_v42, %v997_v23 }
 0x15f   :  { %629 = vrot.lane.b32.xlu0 %v570_v4, %s2692_s7 }
 0x160   :  { %2631 = vset.pattern.permute.xlu1 %v4138_v21  ;;  %765 = vperm.xlu2 %2630, %v2287_v15   ;;  %v3260_v38 = vpop.permute.xlu0 %452 }
 0x161   :  { %464 = vperm.xlu1 %2631, %v2256_v57  }
 0x162   :  { %v384_v16 = vpop.permute.xlu1 %383 }
 0x163   :  { %v441_v18 = vmul.f32 %v2854_v42, %v384_v16 }
 0x164   :  { %v419_v26 = vpop.permute.xlu2 %418 }
 0x165   :  { %v3252_v60 = vadd.f32 %v541_v32, %v441_v18  ;;  %v2285_v18 = vld [vmem:[%s4130_s1 + $0x1a0] sm:$0xff] }
 0x167   :  { %822 = vperm.xlu0 %2607, %v3250_v39  }
 0x168   :  { %2632 = vset.pattern.permute.xlu2 %v4138_v21 }
 0x169   :  { %870 = vperm.xlu1 %2631, %v2287_v15   ;;  %874 = vperm.xlu2 %2632, %v2288_v25   ;;  %v3276_v15 = vpop.permute.xlu0 %866 }
 0x16b   :  { %v497_v43 = vpop.permute.xlu1 %496 }
 0x16c   :  { %v542_v49 = vmul.f32 %v2865_v46, %v497_v43  ;;  %v374_v0 = vpop.permute.xlu2 %373 }
 0x16d   :  { %v439_v4 = vmul.f32 %v2854_v42, %v374_v0 }
 0x16e   :  { %v3263_v57 = vadd.f32 %v542_v49, %v442_v12  ;;  %v547_v12 = vmul.f32 %v2865_v46, %v3176_v54  ;;  %v1189_v54 = vmul.f32 %v2865_v46, %v3060_v33 }
 0x16f   :  { %2651 = vset.pattern.permute.xlu0 %v4136_v3 }
 0x170   :  { %1001 = vperm.xlu0 %2651, %v3109_v61  }
 0x171   :  { %2633 = vset.pattern.permute.xlu1 %v4136_v3  ;;  %2634 = vset.pattern.permute.xlu2 %v4136_v3  ;;  %v3291_v0 = vpop.permute.xlu0 %1260 }
 0x172   :  { %333 = vperm.xlu1 %2633, %v3067_v35   ;;  %338 = vperm.xlu2 %2634, %v2254_v19  }
 0x173   :  { %v1112_v41 = vpop.permute.xlu1 %1111 }
 0x174   :  { %v1178_v45 = vmul.f32 %v2865_v46, %v1112_v41 }
 0x175   :  { %v485_v16 = vpop.permute.xlu2 %484 }
 0x176   :  { %v3278_v32 = vadd.f32 %v1178_v45, %v1078_v56  ;;  %v539_v61 = vmul.f32 %v2865_v46, %v485_v16  ;;  %v2283_v56 = vld [vmem:[%s4130_s1 + $0x190] sm:$0xff]  ;;  %v1188_v45 = vmul.f32 %v2865_v46, %v2991_v59  ;;  %v540_v59 = vmul.f32 %v2865_v46, %v3192_v9 }
 0x177   :  { %v1086_v9 = vmul.f32 %v2854_v42, %v3010_v8 }
 0x178   :  { %368 = vperm.xlu0 %2651, %v3186_v55   ;;  %v3285_v35 = vadd.f32 %v539_v61, %v439_v4  ;;  %v448_v55 = vmul.f32 %v2854_v42, %v419_v26 }
 0x179   :  { %v3313_v61 = vpop.permute.xlu0 %850 }
 0x17a   :  { %2635 = vset.pattern.permute.xlu1 %v4138_v21  ;;  %755 = vperm.xlu2 %2634, %v2285_v18  }
 0x17b   :  { %456 = vperm.xlu1 %2635, %v2254_v19  }
 0x17c   :  { %v414_v23 = vpop.permute.xlu1 %413 }
 0x17d   :  { %v447_v43 = vmul.f32 %v2854_v42, %v414_v23 }
 0x17e   :  { %v992_v49 = vpop.permute.xlu2 %991 }
 0x17f   :  { %v3293_v41 = vadd.f32 %v547_v12, %v447_v43 }
 0x180   :  { %770 = vperm.xlu0 %2651, %v2288_v25   ;;  %v1088_v25 = vmul.f32 %v2854_v42, %v2928_v13 }
 0x182   :  { %2637 = vset.pattern.permute.xlu2 %v4138_v21 }
 0x183   :  { %2636 = vset.pattern.permute.xlu1 %v4136_v3  ;;  %862 = vperm.xlu2 %2637, %v2285_v18   ;;  %v1208_v18 = vadd.f32 %v1188_v45, %v1088_v25  ;;  %v1176_v45 = vmul.f32 %v2865_v46, %v3205_v29 }
 0x184   :  { %760 = vperm.xlu1 %2636, %v3084_v50   ;;  %v1089_v50 = vmul.f32 %v2854_v42, %v3042_v22  ;;  %v2291_v22 = vld [vmem:[%s4130_s1 + $0x1d0] sm:$0xff] }
 0x185   :  { %v521_v19 = vpop.permute.xlu1 %520 }
 0x186   :  { %v548_v4 = vmul.f32 %v2865_v46, %v521_v19  ;;  %v364_v16 = vpop.permute.xlu2 %363  ;;  %v1209_v33 = vadd.f32 %v1189_v54, %v1089_v50  ;;  %v3330_v54 = vpop.permute.xlu0 %842  ;;  %v1186_v19 = vmul.f32 %v2865_v46, %v3079_v48  ;;  %v1077_v48 = vmul.f32 %v2854_v42, %v992_v49 }
 0x188   :  { %v3311_v26 = vadd.f32 %v548_v4, %v448_v55  ;;  %745 = vperm.xlu0 %2651, %v2283_v56   ;;  %v2284_v55 = vld [vmem:[%s4130_s1 + $0x198] sm:$0xff] }
 0x18b   :  { %1264 = vrot.lane.b32.xlu2 %v1209_v33, %s2692_s7  ;;  %v3342_v33 = vld [vmem:[%s4130_s1 + $0x170] sm:$0xff] }
 0x18c   :  { %1262 = vrot.lane.b32.xlu1 %v1208_v18, %s2692_s7 }
 0x18e   :  { %v379_v13 = vpop.permute.xlu1 %378  ;;  %v3350_v8 = vpop.permute.xlu0 %1250 }
 0x18f   :  { %v440_v23 = vmul.f32 %v2854_v42, %v379_v13  ;;  %v3320_v12 = vpop.permute.xlu2 %480  ;;  %v3356_v13 = vld [vmem:[%s4130_s1 + $0x160] sm:$0xff] }
 0x190   :  { %785 = vperm.xlu0 %2651, %v2291_v22  }
 0x191   :  { %v3325_v43 = vadd.f32 %v540_v59, %v440_v23 }
 0x193   :  { %854 = vperm.xlu2 %2637, %v2283_v56   ;;  %v1206_v56 = vadd.f32 %v1186_v19, %v1086_v9 }
 0x194   :  { %750 = vperm.xlu1 %2636, %v2284_v55  }
 0x196   :  { %v987_v25 = vpop.permute.xlu1 %986  ;;  %v3366_v49 = vpop.permute.xlu0 %1272 }
 0x197   :  { %v1076_v4 = vmul.f32 %v2854_v42, %v987_v25  ;;  %v437_v25 = vmul.f32 %v2854_v42, %v364_v16 }
 0x198   :  { %v982_v50 = vpop.permute.xlu2 %981  ;;  %725 = vperm.xlu0 %2651, %v3342_v33  }
 0x199   :  { %v3344_v18 = vadd.f32 %v1176_v45, %v1076_v4 }
 0x19b   :  { %1258 = vrot.lane.b32.xlu2 %v1206_v56, %s2692_s7 }
 0x19c   :  { %2638 = vset.pattern.permute.xlu1 %v4138_v21  ;;  %2640 = vset.pattern.permute.xlu2 %v4136_v3 }
 0x19d   :  { %858 = vperm.xlu1 %2638, %v2284_v55   ;;  %v2281_v55 = vld [vmem:[%s4130_s1 + $0x180] sm:$0xff] }
 0x19f   :  { %v1108_v29 = vpop.permute.xlu1 %1107 }
 0x1a0   :  { %v1177_v59 = vmul.f32 %v2865_v46, %v1108_v29  ;;  %v354_v23 = vpop.permute.xlu2 %353  ;;  %715 = vperm.xlu0 %2651, %v3356_v13   ;;  %v2292_v29 = vld [vmem:[%s4130_s1 + $0x1d8] sm:$0xff] }
 0x1a1   :  { %v435_v45 = vmul.f32 %v2854_v42, %v354_v23 }
 0x1a2   :  { %v3360_v9 = vadd.f32 %v1177_v59, %v1077_v48 }
 0x1a3   :  { %740 = vperm.xlu2 %2640, %v3120_v7  }
 0x1a5   :  { %2639 = vset.pattern.permute.xlu1 %v4136_v3  ;;  %v1185_v3 = vmul.f32 %v2865_v46, %v3111_v24 }
 0x1a6   :  { %735 = vperm.xlu1 %2639, %v2281_v55  }
 0x1a7   :  { %v477_v19 = vpop.permute.xlu1 %476 }
 0x1a8   :  { %v537_v4 = vmul.f32 %v2865_v46, %v477_v19  ;;  %v1174_v19 = vmul.f32 %v2865_v46, %v3216_v34  ;;  %v1084_v34 = vmul.f32 %v2854_v42, %v2966_v27  ;;  %v2289_v27 = vld [vmem:[%s4130_s1 + $0x1c0] sm:$0xff] }
 0x1a9   :  { %v469_v56 = vpop.permute.xlu2 %468 }
 0x1aa   :  { %v3372_v48 = vadd.f32 %v537_v4, %v437_v25  ;;  %v535_v7 = vmul.f32 %v2865_v46, %v469_v56 }
 0x1ab   :  { %2641 = vset.pattern.permute.xlu2 %v4138_v21 }
 0x1ac   :  { %846 = vperm.xlu2 %2641, %v2281_v55   ;;  %v3379_v59 = vadd.f32 %v535_v7, %v435_v45  ;;  %v1085_v55 = vmul.f32 %v2854_v42, %v3100_v58  ;;  %v1075_v45 = vmul.f32 %v2854_v42, %v982_v50  ;;  %v1184_v7 = vmul.f32 %v2865_v46, %v3045_v28 }
 0x1ad   :  { %v618_v16 = vpop.permute.xlu0 %617 }
 0x1ae   :  { %790 = vperm.xlu1 %2639, %v2292_v29   ;;  %665 = vst.msk [vmem:[#allocation2 + $0xd0] sm:$0xff] %vm651_vm1, %v618_v16 }
 0x1b0   :  { %v977_v23 = vpop.permute.xlu1 %976 }
 0x1b1   :  { %v1074_v25 = vmul.f32 %v2854_v42, %v977_v23  ;;  %v1205_v23 = vadd.f32 %v1185_v3, %v1085_v55  ;;  %v536_v3 = vmul.f32 %v2865_v46, %v3228_v62  ;;  %v2290_v62 = vld [vmem:[%s4130_s1 + $0x1c8] sm:$0xff] }
 0x1b2   :  { %v349_v4 = vpop.permute.xlu2 %348 }
 0x1b3   :  { %v3385_v56 = vadd.f32 %v1174_v19, %v1074_v25  ;;  %v4141_v25 = vmov 0  }
 0x1b4   :  { %890 = vperm.xlu2 %2641, %v2292_v29  }
 0x1b6   :  { %2642 = vset.pattern.permute.xlu1 %v4138_v21 }
 0x1b7   :  { %886 = vperm.xlu1 %2642, %v2291_v22   ;;  %v1204_v22 = vadd.f32 %v1184_v7, %v1084_v34 }
 0x1b9   :  { %v1100_v16 = vpop.permute.xlu1 %1099 }
 0x1ba   :  { %v1175_v29 = vmul.f32 %v2865_v46, %v1100_v16  ;;  %v766_v19 = vpop.permute.xlu2 %765 }
 0x1bc   :  { %v3398_v24 = vadd.f32 %v1175_v29, %v1075_v45  ;;  %1256 = vrot.lane.b32.xlu2 %v1205_v23, %s2692_s7  ;;  %v3415_v45 = vpop.permute.xlu0 %1266  ;;  %v434_v23 = vmul.f32 %v2854_v42, %v349_v4  ;;  %v545_v4 = vmul.f32 %v2865_v46, %v3131_v11  ;;  %v1192_v11 = vmul.f32 %v2865_v46, %v3166_v47 }
 0x1bd   :  { %2644 = vset.pattern.permute.xlu2 %v4141_v25  ;;  %v1179_v47 = vmul.f32 %v2865_v46, %v3235_v63 }
 0x1bf   :  { %1254 = vrot.lane.b32.xlu1 %v1204_v22, %s2692_s7 }
 0x1c0   :  { %2643 = vset.pattern.permute.xlu1 %v4141_v25 }
 0x1c2   :  { %v359_v28 = vpop.permute.xlu1 %358 }
 0x1c3   :  { %v436_v58 = vmul.f32 %v2854_v42, %v359_v28  ;;  %v3410_v50 = vpop.permute.xlu2 %874 }
 0x1c4   :  { %775 = vperm.xlu2 %2644, %v2289_v27  }
 0x1c5   :  { %v3412_v55 = vadd.f32 %v536_v3, %v436_v58  ;;  %v446_v3 = vmul.f32 %v2854_v42, %v3062_v36  ;;  %v546_v58 = vmul.f32 %v2865_v46, %v3086_v51 }
 0x1c7   :  { %730 = vperm.xlu1 %2643, %v3136_v14   ;;  %v566_v6 = vadd.f32 %v546_v58, %v446_v3 }
 0x1ca   :  { %v3417_v34 = vpop.permute.xlu1 %343 }
 0x1cc   :  { %2645 = vset.pattern.permute.xlu2 %v4138_v21  ;;  %v3420_v7 = vpop.permute.xlu2 %338 }
 0x1cd   :  { %838 = vperm.xlu2 %2645, %v3342_v33  }
 0x1cf   :  { %780 = vperm.xlu1 %2643, %v2290_v62  }
 0x1d1   :  { %v3426_v16 = vpop.permute.xlu0 %629 }
 0x1d3   :  { %v465_v14 = vpop.permute.xlu1 %464 }
 0x1d4   :  { %v534_v29 = vmul.f32 %v2865_v46, %v465_v14  ;;  %v756_v22 = vpop.permute.xlu2 %755 }
 0x1d5   :  { %882 = vperm.xlu2 %2645, %v2290_v62   ;;  %v445_v62 = vmul.f32 %v2854_v42, %v3115_v2  ;;  %v805_v36 = vmul.f32 %v2854_v42, %v756_v22  ;;  %v1092_v2 = vmul.f32 %v2854_v42, %v3102_v1 }
 0x1d6   :  { %v3430_v28 = vadd.f32 %v534_v29, %v434_v23  ;;  %v807_v23 = vmul.f32 %v2854_v42, %v766_v19  ;;  %v1183_v19 = vmul.f32 %v2865_v46, %v3123_v53  ;;  %v3467_v53 = vld [vmem:[%s4131_s2] ss:$0 sm:$0xff] }
 0x1d7   :  { %2646 = vset.pattern.permute.xlu1 %v4138_v21  ;;  %v1212_v58 = vadd.f32 %v1192_v11, %v1092_v2  ;;  %v2662_v11 = vld [vmem:[%s4130_s1 + $0x98] sm:$0xff] }
 0x1d8   :  { %878 = vperm.xlu1 %2646, %v2289_v27   ;;  %v565_v27 = vadd.f32 %v545_v4, %v445_v62  ;;  %v531_v4 = vmul.f32 %v2865_v46, %v3260_v38 }
 0x1d9   :  { %v3437_v33 = vpop.permute.xlu0 %822 }
 0x1da   :  { %4142 = vst [vmem:[#allocation7_spill] sm:$0xff] %v3437_v33 }
 0x1db   :  { %v871_v14 = vpop.permute.xlu1 %870 }
 0x1dc   :  { %v907_v29 = vmul.f32 %v2865_v46, %v871_v14 }
 0x1dd   :  { %v863_v51 = vpop.permute.xlu2 %862  ;;  %621 = vrot.lane.b32.xlu2 %v566_v6, %s2692_s7  ;;  %v1083_v6 = vmul.f32 %v2854_v42, %v3148_v37 }
 0x1de   :  { %v927_v21 = vadd.f32 %v907_v29, %v807_v23  ;;  %v905_v33 = vmul.f32 %v2865_v46, %v863_v51  ;;  %v3478_v46 = vld [vmem:[%s4131_s2 + $0x1] ss:$0 sm:$0xff]  ;;  %s2694_s2 = smov 4  }
 0x1df   :  { %v1203_v62 = vadd.f32 %v1183_v19, %v1083_v6  ;;  %v538_v63 = vmul.f32 %v3478_v46, %v3320_v12  ;;  %v2663_v12 = vld [vmem:[%s4130_s1 + $0x90] sm:$0xff]  ;;  %v908_v2 = vmul.f32 %v3478_v46, %v3410_v50  ;;  %v906_v50 = vmul.f32 %v3478_v46, %v3276_v15 }
 0x1e0   :  { %947 = vst.msk [vmem:[#allocation2 + $0xe8] sm:$0xff] %vm289_vm0, %v927_v21  ;;  %v925_v3 = vadd.f32 %v905_v33, %v805_v36  ;;  %619 = vrot.lane.b32.xlu1 %v565_v27, %s2692_s7  ;;  %v3486_v36 = vld [vmem:[%s4130_s1 + $0x140] sm:$0xff] }
 0x1e2   :  { %945 = vst.msk [vmem:[#allocation2 + $0xc8] sm:$0xff] %vm289_vm0, %v925_v3  ;;  %v1002_v22 = vpop.permute.xlu0 %1001 }
 0x1e3   :  { %v1079_v21 = vmul.f32 %v2854_v42, %v1002_v22 }
 0x1e4   :  { %v334_v33 = vpop.permute.xlu1 %333 }
 0x1e5   :  { %v1199_v1 = vadd.f32 %v1179_v47, %v1079_v21  ;;  %v431_v37 = vmul.f32 %v3467_v53, %v334_v33  ;;  %v1265_v14 = vpop.permute.xlu2 %1264  ;;  %1270 = vrot.lane.b32.xlu2 %v1212_v58, %s2692_s7  ;;  %v543_v58 = vmul.f32 %v3478_v46, %v3140_v17  ;;  %v2278_v21 = vld [vmem:[%s4130_s1 + $0x168] sm:$0xff]  ;;  %v443_v33 = vmul.f32 %v3467_v53, %v3174_v44 }
 0x1e6   :  { %v4143_v17 = vmov 1  }
 0x1e7   :  { %v3471_v23 = vadd.f32 %v531_v4, %v431_v37  ;;  %1244 = vrot.lane.b32.xlu0 %v1199_v1, %s2692_s7  ;;  %v563_v37 = vadd.f32 %v543_v58, %v443_v33 }
 0x1e8   :  { %1252 = vrot.lane.b32.xlu1 %v1203_v62, %s2692_s7  ;;  %v902_v62 = vmul.f32 %v3478_v46, %v3313_v61  ;;  %v1080_v61 = vmul.f32 %v3467_v53, %v3156_v31  ;;  %v533_v31 = vmul.f32 %v3478_v46, %v3242_v30 }
 0x1ea   :  { %v369_v42 = vpop.permute.xlu0 %368 }
 0x1eb   :  { %v438_v38 = vmul.f32 %v3467_v53, %v369_v42 }
 0x1ed   :  { %v3488_v29 = vadd.f32 %v538_v63, %v438_v38  ;;  %v3490_v51 = vpop.permute.xlu1 %456  ;;  %v855_v27 = vpop.permute.xlu2 %854  ;;  %245 = vperm.xlu2 %2645, %v2662_v11  }
 0x1ee   :  { %v903_v4 = vmul.f32 %v3478_v46, %v855_v27  ;;  %v532_v30 = vmul.f32 %v3478_v46, %v3490_v51 }
 0x1ef   :  { %695 = vperm.xlu0 %2651, %v3486_v36  }
 0x1f0   :  { %241 = vperm.xlu1 %2646, %v2663_v12  }
 0x1f2   :  { %v771_v3 = vpop.permute.xlu0 %770 }
 0x1f3   :  { %v808_v19 = vmul.f32 %v3467_v53, %v771_v3 }
 0x1f5   :  { %v928_v6 = vadd.f32 %v908_v2, %v808_v19  ;;  %v1259_v22 = vpop.permute.xlu2 %1258  ;;  %830 = vperm.xlu2 %2645, %v3356_v13  }
 0x1f6   :  { %1306 = vst.msk [vmem:[#allocation2 + $0xc8] sm:$0xff] %vm651_vm1, %v1259_v22  ;;  %v761_v47 = vpop.permute.xlu1 %760 }
 0x1f7   :  { %948 = vst.msk [vmem:[#allocation2 + $0xf8] sm:$0xff] %vm289_vm0, %v928_v6  ;;  %v806_v13 = vmul.f32 %v3467_v53, %v761_v47  ;;  %609 = vrot.lane.b32.xlu0 %v3325_v43, %s2692_s7  ;;  %v433_v6 = vmul.f32 %v3467_v53, %v3417_v34 }
 0x1f8   :  { %1309 = vst.msk [vmem:[#allocation2 + $0xf8] sm:$0xff] %vm651_vm1, %v1265_v14  ;;  %2647 = vset.pattern.permute.xlu1 %v4141_v25  ;;  %2656 = vset.pattern.permute.xlu0 %v4143_v17 }
 0x1f9   :  { %v926_v1 = vadd.f32 %v906_v50, %v806_v13  ;;  %720 = vperm.xlu1 %2647, %v2278_v21   ;;  %v553_v22 = vadd.f32 %v533_v31, %v433_v6 }
 0x1fa   :  { %v746_v44 = vpop.permute.xlu0 %745 }
 0x1fb   :  { %946 = vst.msk [vmem:[#allocation2 + $0xd8] sm:$0xff] %vm289_vm0, %v926_v1  ;;  %v803_v15 = vmul.f32 %v3467_v53, %v746_v44 }
 0x1fc   :  { %1307 = vst.msk [vmem:[#allocation2 + $0xd8] sm:$0xff] %vm651_vm1, %v3291_v0  ;;  %v1180_v0 = vmul.f32 %v3478_v46, %v3214_v10 }
 0x1fd   :  { %v741_v43 = vpop.permute.xlu2 %740  ;;  %615 = vrot.lane.b32.xlu2 %v563_v37, %s2692_s7  ;;  %v923_v14 = vadd.f32 %v903_v4, %v803_v15 }
 0x1fe   :  { %v802_v42 = vmul.f32 %v3467_v53, %v741_v43  ;;  %v1263_v63 = vpop.permute.xlu1 %1262  ;;  %2650 = vset.pattern.permute.xlu2 %v4141_v25  ;;  %v1200_v2 = vadd.f32 %v1180_v0, %v1080_v61 }
 0x1ff   :  { %1308 = vst.msk [vmem:[#allocation2 + $0xe8] sm:$0xff] %vm651_vm1, %v1263_v63  ;;  %603 = vrot.lane.b32.xlu0 %v3372_v48, %s2692_s7  ;;  %v1365_v12 = vld [vmem:[#allocation2 + $0xf8] sm:$0xff] }
 0x200   :  { %v922_v38 = vadd.f32 %v902_v62, %v802_v42  ;;  %943 = vst.msk [vmem:[#allocation2 + $0xa8] sm:$0xff] %vm289_vm0, %v923_v14 }
 0x201   :  { %2648 = vset.pattern.permute.xlu1 %v4143_v17 }
 0x202   :  { %942 = vst.msk [vmem:[#allocation2 + $0x98] sm:$0xff] %vm289_vm0, %v922_v38  ;;  %834 = vperm.xlu1 %2648, %v2278_v21   ;;  %v432_v21 = vmul.f32 %v3467_v53, %v3420_v7  ;;  %v786_v1 = vpop.permute.xlu0 %785 }
 0x203   :  { %v1361_v19 = vld [vmem:[#allocation2 + $0xd8] sm:$0xff]  ;;  %v811_v62 = vmul.f32 %v3467_v53, %v786_v1 }
 0x204   :  { %v552_v50 = vadd.f32 %v532_v30, %v432_v21 }
 0x205   :  { %1248 = vrot.lane.b32.xlu2 %v3181_v52, %s2692_s7  ;;  %v1359_v52 = vld [vmem:[#allocation2 + $0xc8] sm:$0xff] }
 0x206   :  { %v751_v27 = vpop.permute.xlu1 %750  ;;  %v847_v11 = vpop.permute.xlu2 %846  ;;  %v1363_v48 = vld [vmem:[#allocation2 + $0xe8] sm:$0xff]  ;;  %v1387_v10 = vpack.c.bf16 %v1361_v19, %v1359_v52 }
 0x207   :  { %1236 = vrot.lane.b32.xlu0 %v3398_v24, %s2692_s7  ;;  %v1389_v3 = vpack.c.bf16 %v1365_v12, %v1363_v48  ;;  %v804_v34 = vmul.f32 %v3467_v53, %v751_v27  ;;  %v901_v4 = vmul.f32 %v3478_v46, %v847_v11  ;;  %v900_v48 = vmul.f32 %v3478_v46, %v3330_v54 }
 0x209   :  { %1639 = vmatpush.bf16.msra.mxu2 %v1389_v3 }
 0x20a   :  { %1246 = vrot.lane.b32.xlu1 %v1200_v2, %s2692_s7 }
 0x20b   :  { %2649 = vset.pattern.permute.xlu1 %v4141_v25 }
 0x20d   :  { %1640 = vmatpush.bf16.msra.mxu2 %v1387_v10  ;;  %627 = vrot.lane.b32.xlu2 %v3211_v20, %s2692_s7  ;;  %v2276_v20 = vld [vmem:[%s4130_s1 + $0x158] sm:$0xff]  ;;  %v167_v10 = vmul.f32 %v3467_v53, %v2909_v5 }
 0x20e   :  { %v891_v24 = vpop.permute.xlu2 %890 }
 0x20f   :  { %v859_v58 = vpop.permute.xlu1 %858  ;;  %595 = vrot.lane.b32.xlu0 %v553_v22, %s2692_s7  ;;  %v912_v37 = vmul.f32 %v3478_v46, %v891_v24 }
 0x210   :  { %v904_v47 = vmul.f32 %v3478_v46, %v859_v58 }
 0x212   :  { %v924_v33 = vadd.f32 %v904_v47, %v804_v34  ;;  %1268 = vrot.lane.b32.xlu1 %v3223_v40, %s2692_s7 }
 0x214   :  { %944 = vst.msk [vmem:[#allocation2 + $0xb8] sm:$0xff] %vm289_vm0, %v924_v33 }
 0x215   :  { %710 = vperm.xlu2 %2650, %v2276_v20  }
 0x216   :  { %v1257_v13 = vpop.permute.xlu2 %1256 }
 0x217   :  { %1305 = vst.msk [vmem:[#allocation2 + $0xb8] sm:$0xff] %vm651_vm1, %v1257_v13  ;;  %593 = vrot.lane.b32.xlu0 %v552_v50, %s2692_s7 }
 0x218   :  { %v736_v7 = vpop.permute.xlu1 %735 }
 0x219   :  { %v801_v51 = vmul.f32 %v3467_v53, %v736_v7 }
 0x21a   :  { %705 = vperm.xlu1 %2649, %v3250_v39  }
 0x21b   :  { %v921_v40 = vadd.f32 %v901_v4, %v801_v51 }
 0x21d   :  { %941 = vst.msk [vmem:[#allocation2 + $0x88] sm:$0xff] %vm289_vm0, %v921_v40  ;;  %611 = vrot.lane.b32.xlu2 %v3252_v60, %s2692_s7  ;;  %v726_v60 = vpop.permute.xlu0 %725 }
 0x21e   :  { %1302 = vst.msk [vmem:[#allocation2 + $0x88] sm:$0xff] %vm651_vm1, %v3350_v8  ;;  %v3575_v44 = vpop.permute.xlu2 %775  ;;  %2654 = vset.pattern.permute.xlu2 %v4143_v17  ;;  %v799_v8 = vmul.f32 %v3467_v53, %v726_v60  ;;  %v1357_v11 = vld [vmem:[#allocation2 + $0xb8] sm:$0xff] }
 0x220   :  { %v791_v15 = vpop.permute.xlu1 %790 }
 0x221   :  { %v812_v43 = vmul.f32 %v3467_v53, %v791_v15  ;;  %v4144_v15 = vld [vmem:[#allocation6_spill] sm:$0xff] }
 0x222   :  { %2652 = vset.pattern.permute.xlu1 %v4143_v17 }
 0x223   :  { %v932_v39 = vadd.f32 %v912_v37, %v812_v43  ;;  %826 = vperm.xlu1 %2652, %v2276_v20   ;;  %v166_v43 = vmul.f32 %v3467_v53, %v4144_v15 }
 0x225   :  { %952 = vst.msk [vmem:[#allocation2 + $0x138] sm:$0xff] %vm289_vm0, %v932_v39  ;;  %1242 = vrot.lane.b32.xlu2 %v3278_v32, %s2692_s7 }
 0x226   :  { %1313 = vst.msk [vmem:[#allocation2 + $0x138] sm:$0xff] %vm651_vm1, %v3366_v49 }
 0x227   :  { %v839_v14 = vpop.permute.xlu2 %838 }
 0x228   :  { %v899_v42 = vmul.f32 %v3478_v46, %v839_v14 }
 0x229   :  { %v887_v63 = vpop.permute.xlu1 %886 }
 0x22a   :  { %v911_v38 = vmul.f32 %v3478_v46, %v887_v63  ;;  %v919_v0 = vadd.f32 %v899_v42, %v799_v8 }
 0x22b   :  { %613 = vrot.lane.b32.xlu1 %v3263_v57, %s2692_s7 }
 0x22c   :  { %v931_v61 = vadd.f32 %v911_v38, %v811_v62  ;;  %939 = vst.msk [vmem:[#allocation2 + $0x68] sm:$0xff] %vm289_vm0, %v919_v0  ;;  %2653 = vset.pattern.permute.xlu1 %v4141_v25  ;;  %v2274_v25 = vld [vmem:[%s4130_s1 + $0x148] sm:$0xff] }
 0x22d   :  { %625 = vrot.lane.b32.xlu2 %v3311_v26, %s2692_s7  ;;  %v1373_v31 = vld [vmem:[#allocation2 + $0x138] sm:$0xff] }
 0x22e   :  { %951 = vst.msk [vmem:[#allocation2 + $0x128] sm:$0xff] %vm289_vm0, %v931_v61 }
 0x22f   :  { %v883_v32 = vpop.permute.xlu2 %882 }
 0x230   :  { %v910_v2 = vmul.f32 %v3478_v46, %v883_v32 }
 0x231   :  { %v1255_v49 = vpop.permute.xlu1 %1254 }
 0x232   :  { %1304 = vst.msk [vmem:[#allocation2 + $0xa8] sm:$0xff] %vm651_vm1, %v1255_v49 }
 0x233   :  { %623 = vrot.lane.b32.xlu1 %v3293_v41, %s2692_s7 }
 0x235   :  { %814 = vperm.xlu2 %2654, %v3486_v36  }
 0x237   :  { %v622_v57 = vpop.permute.xlu2 %621 }
 0x238   :  { %667 = vst.msk [vmem:[#allocation2 + $0xf0] sm:$0xff] %vm651_vm1, %v622_v57 }
 0x239   :  { %v731_v27 = vpop.permute.xlu1 %730  ;;  %v1355_v26 = vld [vmem:[#allocation2 + $0xa8] sm:$0xff] }
 0x23a   :  { %v800_v12 = vmul.f32 %v3467_v53, %v731_v27  ;;  %v1385_v3 = vpack.c.bf16 %v1357_v11, %v1355_v26 }
 0x23b   :  { %700 = vperm.xlu1 %2653, %v2274_v25  }
 0x23c   :  { %v920_v41 = vadd.f32 %v900_v48, %v800_v12  ;;  %1641 = vmatpush.bf16.msra.mxu2 %v1385_v3 }
 0x23d   :  { %607 = vrot.lane.b32.xlu2 %v3285_v35, %s2692_s7 }
 0x23e   :  { %940 = vst.msk [vmem:[#allocation2 + $0x78] sm:$0xff] %vm289_vm0, %v920_v41 }
 0x23f   :  { %v1271_v36 = vpop.permute.xlu2 %1270  ;;  %v1364_v13 = vld [vmem:[#allocation2 + $0xf0] sm:$0xff] }
 0x240   :  { %1312 = vst.msk [vmem:[#allocation2 + $0x128] sm:$0xff] %vm651_vm1, %v1271_v36 }
 0x241   :  { %v781_v19 = vpop.permute.xlu1 %780 }
 0x242   :  { %v810_v6 = vmul.f32 %v3467_v53, %v781_v19 }
 0x243   :  { %2655 = vset.pattern.permute.xlu1 %v4143_v17  ;;  %v809_v17 = vmul.f32 %v3467_v53, %v3575_v44  ;;  %v1351_v44 = vld [vmem:[#allocation2 + $0x88] sm:$0xff] }
 0x244   :  { %v930_v54 = vadd.f32 %v910_v2, %v810_v6  ;;  %818 = vperm.xlu1 %2655, %v2274_v25  }
 0x245   :  { %1240 = vrot.lane.b32.xlu2 %v3360_v9, %s2692_s7  ;;  %v716_v9 = vpop.permute.xlu0 %715 }
 0x246   :  { %950 = vst.msk [vmem:[#allocation2 + $0x118] sm:$0xff] %vm289_vm0, %v930_v54  ;;  %v797_v30 = vmul.f32 %v3467_v53, %v716_v9 }
 0x247   :  { %v246_v35 = vpop.permute.xlu2 %245  ;;  %v1371_v52 = vld [vmem:[#allocation2 + $0x128] sm:$0xff] }
 0x248   :  { %v268_v22 = vmul.f32 %v3478_v46, %v246_v35  ;;  %v1393_v24 = vpack.c.bf16 %v1373_v31, %v1371_v52 }
 0x24a   :  { %v288_v58 = vadd.f32 %v268_v22, %v167_v10  ;;  %v879_v34 = vpop.permute.xlu1 %878  ;;  %1704 = vmatpush.bf16.msra.mxu3 %v1393_v24  ;;  %v4145_v10 = vld [vmem:[#allocation7_spill] sm:$0xff] }
 0x24b   :  { %v909_v47 = vmul.f32 %v3478_v46, %v879_v34  ;;  %v895_v22 = vmul.f32 %v3478_v46, %v4145_v10 }
 0x24c   :  { %309 = vst.msk [vmem:[#allocation2 + $0x130] sm:$0xff] %vm289_vm0, %v288_v58  ;;  %1238 = vrot.lane.b32.xlu1 %v3344_v18, %s2692_s7 }
 0x24d   :  { %671 = vst.msk [vmem:[#allocation2 + $0x130] sm:$0xff] %vm651_vm1, %v3426_v16  ;;  %v929_v5 = vadd.f32 %v909_v47, %v809_v17  ;;  %1234 = vrot.lane.b32.xlu2 %v3385_v56, %s2692_s7 }
 0x24f   :  { %949 = vst.msk [vmem:[#allocation2 + $0x108] sm:$0xff] %vm289_vm0, %v929_v5  ;;  %v831_v21 = vpop.permute.xlu2 %830 }
 0x250   :  { %1310 = vst.msk [vmem:[#allocation2 + $0x108] sm:$0xff] %vm651_vm1, %v3415_v45  ;;  %v897_v33 = vmul.f32 %v3478_v46, %v831_v21 }
 0x252   :  { %v917_v20 = vadd.f32 %v897_v33, %v797_v30  ;;  %v620_v18 = vpop.permute.xlu1 %619 }
 0x253   :  { %666 = vst.msk [vmem:[#allocation2 + $0xe0] sm:$0xff] %vm651_vm1, %v620_v18 }
 0x254   :  { %937 = vst.msk [vmem:[#allocation2 + $0x48] sm:$0xff] %vm289_vm0, %v917_v20  ;;  %605 = vrot.lane.b32.xlu1 %v3488_v29, %s2692_s7  ;;  %v1372_v63 = vld [vmem:[#allocation2 + $0x130] sm:$0xff] }
 0x255   :  { %601 = vrot.lane.b32.xlu2 %v3412_v55, %s2692_s7  ;;  %v1360_v55 = vld [vmem:[#allocation2 + $0xd0] sm:$0xff] }
 0x257   :  { %v616_v56 = vpop.permute.xlu2 %615  ;;  %v1367_v52 = vld [vmem:[#allocation2 + $0x108] sm:$0xff] }
 0x258   :  { %664 = vst.msk [vmem:[#allocation2 + $0xc0] sm:$0xff] %vm651_vm1, %v616_v56 }
 0x259   :  { %v1245_v16 = vpop.permute.xlu0 %1244 }
 0x25a   :  { %v1253_v50 = vpop.permute.xlu1 %1252  ;;  %v1362_v45 = vld [vmem:[#allocation2 + $0xe0] sm:$0xff] }
 0x25b   :  { %1303 = vst.msk [vmem:[#allocation2 + $0x98] sm:$0xff] %vm651_vm1, %v1253_v50  ;;  %v1388_v4 = vpack.c.bf16 %v1364_v13, %v1362_v45  ;;  %v2487_v50 = vld [vmem:[%s4129_s0 + $0x4] sm:$0xf]  ;;  %v2317_v45 = vld [vmem:[%s4129_s0 + $0x8] sm:$0xf0] }
 0x25c   :  { %599 = vrot.lane.b32.xlu1 %v3379_v59, %s2692_s7  ;;  %v3690_v13 = vor.u32 %v2487_v50, %v2317_v45  ;;  %v2497_v50 = vld [vmem:[%s4129_s0 + $0x54] sm:$0xf]  ;;  %v2357_v45 = vld [vmem:[%s4129_s0 + $0x58] sm:$0xf0] }
 0x25d   :  { %591 = vrot.lane.b32.xlu2 %v3471_v23, %s2692_s7  ;;  %1521 = vmatpush.bf16.msra.mxu0 %v1388_v4 }
 0x25f   :  { %v1249_v29 = vpop.permute.xlu2 %1248  ;;  %v1358_v7 = vld [vmem:[#allocation2 + $0xc0] sm:$0xff] }
 0x260   :  { %1301 = vst.msk [vmem:[#allocation2 + $0x78] sm:$0xff] %vm651_vm1, %v1249_v29  ;;  %v1386_v51 = vpack.c.bf16 %v1360_v55, %v1358_v7 }
 0x261   :  { %v696_v40 = vpop.permute.xlu0 %695 }
 0x262   :  { %v242_v1 = vpop.permute.xlu1 %241  ;;  %1522 = vmatpush.bf16.msra.mxu0 %v1386_v51  ;;  %v1353_v37 = vld [vmem:[#allocation2 + $0x98] sm:$0xff]  ;;  %v793_v47 = vmul.f32 %v3467_v53, %v696_v40 }
 0x263   :  { %v267_v59 = vmul.f32 %v3478_v46, %v242_v1  ;;  %v1383_v39 = vpack.c.bf16 %v1353_v37, %v1351_v44 }
 0x264   :  { %597 = vrot.lane.b32.xlu1 %v3430_v28, %s2692_s7 }
 0x265   :  { %v287_v23 = vadd.f32 %v267_v59, %v166_v43  ;;  %1642 = vmatpush.bf16.msra.mxu2 %v1383_v39 }
 0x267   :  { %308 = vst.msk [vmem:[#allocation2 + $0x120] sm:$0xff] %vm289_vm0, %v287_v23  ;;  %v628_v60 = vpop.permute.xlu2 %627  ;;  %v1349_v3 = vld [vmem:[#allocation2 + $0x78] sm:$0xff]  ;;  %v2489_v23 = vld [vmem:[%s4129_s0 + $0x14] sm:$0xf] }
 0x268   :  { %670 = vst.msk [vmem:[#allocation2 + $0x120] sm:$0xff] %vm651_vm1, %v628_v60  ;;  %v2325_v60 = vld [vmem:[%s4129_s0 + $0x18] sm:$0xf0] }
 0x269   :  { %v610_v8 = vpop.permute.xlu0 %609 }
 0x26a   :  { %661 = vst.msk [vmem:[#allocation2 + $0x90] sm:$0xff] %vm651_vm1, %v610_v8  ;;  %v3703_v8 = vor.u32 %v2489_v23, %v2325_v60  ;;  %v2355_v23 = vld [vmem:[%s4129_s0 + $0x50] sm:$0xf]  ;;  %v2498_v60 = vld [vmem:[%s4129_s0 + $0x54] sm:$0xf0] }
 0x26b   :  { %v721_v14 = vpop.permute.xlu1 %720 }
 0x26c   :  { %v798_v61 = vmul.f32 %v3467_v53, %v721_v14 }
 0x26f   :  { %v711_v62 = vpop.permute.xlu2 %710  ;;  %v1370_v42 = vld [vmem:[#allocation2 + $0x120] sm:$0xff] }
 0x270   :  { %v1392_v38 = vpack.c.bf16 %v1372_v63, %v1370_v42  ;;  %v796_v30 = vmul.f32 %v3467_v53, %v711_v62 }
 0x271   :  { %v604_v0 = vpop.permute.xlu0 %603  ;;  %v1352_v1 = vld [vmem:[#allocation2 + $0x90] sm:$0xff] }
 0x272   :  { %658 = vst.msk [vmem:[#allocation2 + $0x60] sm:$0xff] %vm651_vm1, %v604_v0  ;;  %1586 = vmatpush.bf16.msra.mxu1 %v1392_v38 }
 0x274   :  { %v835_v28 = vpop.permute.xlu1 %834 }
 0x275   :  { %v898_v32 = vmul.f32 %v3478_v46, %v835_v28  ;;  %v2491_v28 = vld [vmem:[%s4129_s0 + $0x24] sm:$0xf] }
 0x277   :  { %v918_v49 = vadd.f32 %v898_v32, %v798_v61  ;;  %v612_v57 = vpop.permute.xlu2 %611 }
 0x278   :  { %662 = vst.msk [vmem:[#allocation2 + $0xa0] sm:$0xff] %vm651_vm1, %v612_v57 }
 0x279   :  { %938 = vst.msk [vmem:[#allocation2 + $0x58] sm:$0xff] %vm289_vm0, %v918_v49  ;;  %v3662_v25 = vpop.permute.xlu0 %1236 }
 0x27a   :  { %1299 = vst.msk [vmem:[#allocation2 + $0x58] sm:$0xff] %vm651_vm1, %v1245_v16 }
 0x27c   :  { %v1247_v27 = vpop.permute.xlu1 %1246 }
 0x27d   :  { %1300 = vst.msk [vmem:[#allocation2 + $0x68] sm:$0xff] %vm651_vm1, %v1247_v27  ;;  %v2315_v27 = vld [vmem:[%s4129_s0] sm:$0xf] }
 0x27f   :  { %v1243_v26 = vpop.permute.xlu2 %1242  ;;  %v1354_v29 = vld [vmem:[#allocation2 + $0xa0] sm:$0xff] }
 0x280   :  { %1298 = vst.msk [vmem:[#allocation2 + $0x48] sm:$0xff] %vm651_vm1, %v1243_v26  ;;  %v2488_v26 = vld [vmem:[%s4129_s0 + $0x4] sm:$0xf0] }
 0x281   :  { %v596_v11 = vpop.permute.xlu0 %595  ;;  %v1345_v19 = vld [vmem:[#allocation2 + $0x58] sm:$0xff] }
 0x282   :  { %654 = vst.msk [vmem:[#allocation2 + $0x20] sm:$0xff] %vm651_vm1, %v596_v11 }
 0x284   :  { %v1269_v48 = vpop.permute.xlu1 %1268  ;;  %v1347_v12 = vld [vmem:[#allocation2 + $0x68] sm:$0xff] }
 0x285   :  { %1311 = vst.msk [vmem:[#allocation2 + $0x118] sm:$0xff] %vm651_vm1, %v1269_v48  ;;  %v1381_v41 = vpack.c.bf16 %v1349_v3, %v1347_v12  ;;  %v3735_v12 = vor.u32 %v2488_v26, %v2315_v27  ;;  %v2505_v26 = vld [vmem:[%s4129_s0 + $0x94] sm:$0xf] }
 0x287   :  { %1643 = vmatpush.bf16.msra.mxu2 %v1381_v41  ;;  %v626_v36 = vpop.permute.xlu2 %625  ;;  %v1343_v2 = vld [vmem:[#allocation2 + $0x48] sm:$0xff]  ;;  %v1346_v41 = vld [vmem:[#allocation2 + $0x60] sm:$0xff] }
 0x288   :  { %669 = vst.msk [vmem:[#allocation2 + $0x110] sm:$0xff] %vm651_vm1, %v626_v36  ;;  %v1379_v6 = vpack.c.bf16 %v1345_v19, %v1343_v2  ;;  %v2493_v19 = vld [vmem:[%s4129_s0 + $0x34] sm:$0xf] }
 0x289   :  { %v594_v54 = vpop.permute.xlu0 %593 }
 0x28a   :  { %653 = vst.msk [vmem:[#allocation2 + $0x10] sm:$0xff] %vm651_vm1, %v594_v54 }
 0x28b   :  { %1644 = vmatpush.bf16.msra.mxu2 %v1379_v6  ;;  %v2341_v6 = vld [vmem:[%s4129_s0 + $0x38] sm:$0xf0] }
 0x28c   :  { %v706_v35 = vpop.permute.xlu1 %705  ;;  %v1369_v31 = vld [vmem:[#allocation2 + $0x118] sm:$0xff]  ;;  %v3745_v54 = vor.u32 %v2493_v19, %v2341_v6  ;;  %v2371_v6 = vld [vmem:[%s4129_s0 + $0x70] sm:$0xf] }
 0x28d   :  { %v795_v24 = vmul.f32 %v3467_v53, %v706_v35  ;;  %v1391_v58 = vpack.c.bf16 %v1369_v31, %v1367_v52 }
 0x28f   :  { %v915_v34 = vadd.f32 %v895_v22, %v795_v24  ;;  %1705 = vmatpush.bf16.msra.mxu3 %v1391_v58  ;;  %v815_v17 = vpop.permute.xlu2 %814  ;;  %v1368_v43 = vld [vmem:[#allocation2 + $0x110] sm:$0xff]  ;;  %v2490_v24 = vld [vmem:[%s4129_s0 + $0x14] sm:$0xf0] }
 0x290   :  { %v893_v9 = vmul.f32 %v3478_v46, %v815_v17  ;;  %v2323_v22 = vld [vmem:[%s4129_s0 + $0x10] sm:$0xf] }
 0x291   :  { %935 = vst.msk [vmem:[#allocation2 + $0x28] sm:$0xff] %vm289_vm0, %v915_v34  ;;  %v3758_v58 = vor.u32 %v2490_v24, %v2323_v22  ;;  %v1338_v34 = vld [vmem:[#allocation2 + $0x20] sm:$0xff]  ;;  %v2512_v22 = vld [vmem:[%s4133_s4 + $0x28] sm:$0xff] }
 0x292   :  { %v913_v5 = vadd.f32 %v893_v9, %v793_v47  ;;  %2403 = vmatmul.msk.bf16.vlgmr.msra.gmra.mxu3 %vm1490_vm2, %v3690_v13 }
 0x294   :  { %933 = vst.msk [vmem:[#allocation2 + $0x8] sm:$0xff] %vm289_vm0, %v913_v5  ;;  %v2495_v5 = vld [vmem:[%s4129_s0 + $0x44] sm:$0xf] }
 0x295   :  { %v827_v21 = vpop.permute.xlu1 %826 }
 0x296   :  { %v896_v33 = vmul.f32 %v3478_v46, %v827_v21  ;;  %v2349_v21 = vld [vmem:[%s4129_s0 + $0x48] sm:$0xf0] }
 0x297   :  { %v608_v20 = vpop.permute.xlu2 %607 }
 0x298   :  { %v916_v18 = vadd.f32 %v896_v33, %v796_v30  ;;  %660 = vst.msk [vmem:[#allocation2 + $0x80] sm:$0xff] %vm651_vm1, %v608_v20  ;;  %v3767_v30 = vor.u32 %v2495_v5, %v2349_v21  ;;  %v1336_v33 = vld [vmem:[#allocation2 + $0x10] sm:$0xff]  ;;  %v2379_v21 = vld [vmem:[%s4129_s0 + $0x80] sm:$0xf] }
 0x29a   :  { %936 = vst.msk [vmem:[#allocation2 + $0x38] sm:$0xff] %vm289_vm0, %v916_v18  ;;  %v2331_v18 = vld [vmem:[%s4129_s0 + $0x20] sm:$0xf] }
 0x29d   :  { %v614_v56 = vpop.permute.xlu1 %613 }
 0x29e   :  { %663 = vst.msk [vmem:[#allocation2 + $0xb0] sm:$0xff] %vm651_vm1, %v614_v56  ;;  %v2492_v56 = vld [vmem:[%s4129_s0 + $0x24] sm:$0xf0] }
 0x29f   :  { %v1241_v16 = vpop.permute.xlu2 %1240  ;;  %v1350_v40 = vld [vmem:[#allocation2 + $0x80] sm:$0xff] }
 0x2a0   :  { %1297 = vst.msk [vmem:[#allocation2 + $0x38] sm:$0xff] %vm651_vm1, %v1241_v16  ;;  %v1382_v44 = vpack.c.bf16 %v1352_v1, %v1350_v40  ;;  %v3780_v16 = vor.u32 %v2492_v56, %v2331_v18  ;;  %v2365_v40 = vld [vmem:[%s4129_s0 + $0x68] sm:$0xf0] }
 0x2a2   :  { %2404 = vmatmul.msk.bf16.gmra.mxu3 %vm1490_vm2, %v3703_v8 }
 0x2a5   :  { %v624_v4 = vpop.permute.xlu1 %623  ;;  %v1356_v7 = vld [vmem:[#allocation2 + $0xb0] sm:$0xff] }
 0x2a6   :  { %668 = vst.msk [vmem:[#allocation2 + $0x100] sm:$0xff] %vm651_vm1, %v624_v4  ;;  %v1384_v55 = vpack.c.bf16 %v1356_v7, %v1354_v29  ;;  %v3789_v4 = vor.u32 %v2497_v50, %v2357_v45  ;;  %v2339_v29 = vld [vmem:[%s4129_s0 + $0x30] sm:$0xf]  ;;  %v2494_v7 = vld [vmem:[%s4129_s0 + $0x34] sm:$0xf0]  ;;  %v2508_v50 = vld [vmem:[%s4133_s4 + $0x8] sm:$0xff] }
 0x2a7   :  { %v1235_v51 = vpop.permute.xlu2 %1234  ;;  %v1341_v49 = vld [vmem:[#allocation2 + $0x38] sm:$0xff]  ;;  %v1394_v45 = vld [vmem:[%s4132_s3] sm:$0x3] }
 0x2a8   :  { %1294 = vst.msk [vmem:[#allocation2 + $0x8] sm:$0xff] %vm651_vm1, %v1235_v51  ;;  %1523 = vmatpush.bf16.msra.mxu0 %v1384_v55  ;;  %v3802_v55 = vor.u32 %v2494_v7, %v2339_v29  ;;  %v2499_v51 = vld [vmem:[%s4129_s0 + $0x64] sm:$0xf] }
 0x2a9   :  { %v3811_v1 = vor.u32 %v2499_v51, %v2365_v40  ;;  %v2507_v7 = vld [vmem:[%s4133_s4] sm:$0xff]  ;;  %v3972_v40 = vperm.slane %v1394_v45, 1 }
 0x2ac   :  { %1524 = vmatpush.bf16.msra.mxu0 %v1382_v44  ;;  %v2347_v44 = vld [vmem:[%s4129_s0 + $0x40] sm:$0xf] }
 0x2ad   :  { %v701_v37 = vpop.permute.xlu1 %700  ;;  %v1366_v15 = vld [vmem:[#allocation2 + $0x100] sm:$0xff] }
 0x2ae   :  { %v1390_v59 = vpack.c.bf16 %v1368_v43, %v1366_v15  ;;  %v794_v62 = vmul.f32 %v3467_v53, %v701_v37  ;;  %v2333_v53 = vld [vmem:[%s4129_s0 + $0x28] sm:$0xf0]  ;;  %v2496_v37 = vld [vmem:[%s4129_s0 + $0x44] sm:$0xf0]  ;;  %v2501_v43 = vld [vmem:[%s4129_s0 + $0x74] sm:$0xf] }
 0x2af   :  { %v602_v39 = vpop.permute.xlu2 %601  ;;  %v1335_v11 = vld [vmem:[#allocation2 + $0x8] sm:$0xff]  ;;  %v3824_v15 = vor.u32 %v2496_v37, %v2347_v44 }
 0x2b0   :  { %657 = vst.msk [vmem:[#allocation2 + $0x50] sm:$0xff] %vm651_vm1, %v602_v39  ;;  %1587 = vmatpush.bf16.msra.mxu1 %v1390_v59  ;;  %v2373_v59 = vld [vmem:[%s4129_s0 + $0x78] sm:$0xf0] }
 0x2b1   :  { %v3833_v39 = vor.u32 %v2501_v43, %v2373_v59  ;;  %v2387_v43 = vld [vmem:[%s4129_s0 + $0x90] sm:$0xf]  ;;  %v2506_v59 = vld [vmem:[%s4129_s0 + $0x94] sm:$0xf0] }
 0x2b3   :  { %2393 = vmatmul.msk.bf16.vlgmr.msra.gmra.mxu1 %vm1490_vm2, %v3690_v13 }
 0x2b6   :  { %v819_v14 = vpop.permute.xlu1 %818 }
 0x2b7   :  { %v894_v42 = vmul.f32 %v3478_v46, %v819_v14  ;;  %v592_v63 = vpop.permute.xlu2 %591  ;;  %v3722_v46 = vor.u32 %v2491_v28, %v2333_v53  ;;  %v1344_v31 = vld [vmem:[#allocation2 + $0x50] sm:$0xff]  ;;  %v3846_v14 = vor.u32 %v2498_v60, %v2355_v23  ;;  %v2363_v53 = vld [vmem:[%s4129_s0 + $0x60] sm:$0xf] }
 0x2b8   :  { %652 = vst.msk [vmem:[#allocation2] sm:$0xff] %vm651_vm1, %v592_v63  ;;  %v2522_v63 = vld [vmem:[%s4133_s4 + $0x78] sm:$0xff]  ;;  %v2521_v28 = vld [vmem:[%s4133_s4 + $0x70] sm:$0xff] }
 0x2b9   :  { %v914_v38 = vadd.f32 %v894_v42, %v794_v62  ;;  %2405 = vmatmul.msk.bf16.gmra.mxu3 %vm1490_vm2, %v3722_v46  ;;  %v2503_v62 = vld [vmem:[%s4129_s0 + $0x84] sm:$0xf]  ;;  %v2381_v42 = vld [vmem:[%s4129_s0 + $0x88] sm:$0xf0] }
 0x2ba   :  { %2004 = vmatpush.bf16.msrb.mxu3 %v2522_v63  ;;  %v3988_v63 = vor.u32 %v2506_v59, %v2387_v43 }
 0x2bb   :  { %934 = vst.msk [vmem:[#allocation2 + $0x18] sm:$0xff] %vm289_vm0, %v914_v38  ;;  %v3858_v38 = vor.u32 %v2503_v62, %v2381_v42 }
 0x2bc   :  { %1295 = vst.msk [vmem:[#allocation2 + $0x18] sm:$0xff] %vm651_vm1, %v3662_v25 }
 0x2be   :  { %v1239_v0 = vpop.permute.xlu1 %1238  ;;  %2005 = vmatpush.bf16.msrb.mxu3 %v2521_v28 }
 0x2bf   :  { %1296 = vst.msk [vmem:[#allocation2 + $0x28] sm:$0xff] %vm651_vm1, %v1239_v0  ;;  %v1334_v9 = vld [vmem:[#allocation2] sm:$0xff] }
 0x2c0   :  { %v1374_v20 = vpack.c.bf16 %v1336_v33, %v1334_v9  ;;  %v2510_v9 = vld [vmem:[%s4133_s4 + $0x18] sm:$0xff]  ;;  %v2504_v33 = vld [vmem:[%s4129_s0 + $0x84] sm:$0xf0] }
 0x2c1   :  { %v3960_v56 = vor.u32 %v2504_v33, %v2379_v21 }
 0x2c3   :  { %2394 = vmatmul.msk.bf16.gmra.mxu1 %vm1490_vm2, %v3703_v8  ;;  %v1337_v25 = vld [vmem:[#allocation2 + $0x18] sm:$0xff] }
 0x2c4   :  { %v1375_v48 = vpack.c.bf16 %v1337_v25, %v1335_v11  ;;  %v2519_v25 = vld [vmem:[%s4133_s4 + $0x60] sm:$0xff]  ;;  %v2389_v11 = vld [vmem:[%s4129_s0 + $0x98] sm:$0xf0] }
 0x2c6   :  { %v606_v61 = vpop.permute.xlu1 %605  ;;  %v1339_v32 = vld [vmem:[#allocation2 + $0x28] sm:$0xff] }
 0x2c7   :  { %659 = vst.msk [vmem:[#allocation2 + $0x70] sm:$0xff] %vm651_vm1, %v606_v61  ;;  %v1377_v57 = vpack.c.bf16 %v1341_v49, %v1339_v32  ;;  %v2500_v61 = vld [vmem:[%s4129_s0 + $0x64] sm:$0xf0] }
 0x2c8   :  { %v2520_v32 = vld [vmem:[%s4133_s4 + $0x68] sm:$0xff]  ;;  %v3879_v49 = vor.u32 %v2500_v61, %v2363_v53 }
 0x2c9   :  { %1645 = vmatpush.bf16.msra.mxu2 %v1377_v57  ;;  %2406 = vmatmul.msk.bf16.gmra.mxu3 %vm1490_vm2, %v3745_v54 }
 0x2ca   :  { %2006 = vmatpush.bf16.msrb.mxu3 %v2520_v32 }
 0x2cd   :  { %1646 = vmatpush.bf16.msra.mxu2 %v1375_v48  ;;  %v3895_v48 = vor.u32 %v2505_v26, %v2389_v11 }
 0x2ce   :  { %v600_v3 = vpop.permute.xlu1 %599  ;;  %v1348_v36 = vld [vmem:[#allocation2 + $0x70] sm:$0xff]  ;;  %2007 = vmatpush.bf16.msrb.mxu3 %v2519_v25 }
 0x2cf   :  { %656 = vst.msk [vmem:[#allocation2 + $0x40] sm:$0xff] %vm651_vm1, %v600_v3  ;;  %v1380_v2 = vpack.c.bf16 %v1348_v36, %v1346_v41  ;;  %v2518_v3 = vld [vmem:[%s4133_s4 + $0x58] sm:$0xff] }
 0x2d0   :  { %1647 = vmatmul.bf16.vlgmr.msra.gmra.mxu2 %v3735_v12  ;;  %v2514_v41 = vld [vmem:[%s4133_s4 + $0x38] sm:$0xff] }
 0x2d1   :  { %1525 = vmatpush.bf16.msra.mxu0 %v1380_v2  ;;  %1945 = vmatpush.bf16.msrb.mxu1 %v2514_v41  ;;  %v2517_v2 = vld [vmem:[%s4133_s4 + $0x50] sm:$0xff]  ;;  %v3994_v41 = vperm.slane %v1394_v45, 0 }
 0x2d2   :  { %2008 = vmatpush.bf16.msrb.mxu3 %v2518_v3 }
 0x2d3   :  { %2395 = vmatmul.msk.bf16.gmra.mxu1 %vm1490_vm2, %v3722_v46 }
 0x2d6   :  { %v598_v35 = vpop.permute.xlu1 %597  ;;  %v1342_v52 = vld [vmem:[#allocation2 + $0x40] sm:$0xff]  ;;  %2009 = vmatpush.bf16.msrb.mxu3 %v2517_v2 }
 0x2d7   :  { %655 = vst.msk [vmem:[#allocation2 + $0x30] sm:$0xff] %vm651_vm1, %v598_v35  ;;  %v1378_v10 = vpack.c.bf16 %v1344_v31, %v1342_v52  ;;  %v2502_v35 = vld [vmem:[%s4129_s0 + $0x74] sm:$0xf0]  ;;  %v2513_v52 = vld [vmem:[%s4133_s4 + $0x30] sm:$0xff]  ;;  %v2516_v31 = vld [vmem:[%s4133_s4 + $0x48] sm:$0xff] }
 0x2d8   :  { %1946 = vmatpush.bf16.msrb.mxu1 %v2513_v52 }
 0x2d9   :  { %1526 = vmatpush.bf16.msra.mxu0 %v1378_v10  ;;  %2407 = vmatmul.msk.bf16.gmra.mxu3 %vm1490_vm2, %v3767_v30  ;;  %v3927_v10 = vor.u32 %v2502_v35, %v2371_v6 }
 0x2da   :  { %2010 = vmatpush.bf16.msrb.mxu3 %v2516_v31 }
 0x2dc   :  { %1947 = vmatpush.bf16.msrb.mxu1 %v2512_v22 }
 0x2de   :  { %v1340_v17 = vld [vmem:[#allocation2 + $0x30] sm:$0xff] }
 0x2df   :  { %v1376_v47 = vpack.c.bf16 %v1340_v17, %v1338_v34  ;;  %v2515_v34 = vld [vmem:[%s4133_s4 + $0x40] sm:$0xff] }
 0x2e0   :  { %1652 = vmatmul.bf16.gmra.mxu2 %v3758_v58  ;;  %2011 = vmatpush.bf16.msrb.mxu3 %v2515_v34 }
 0x2e1   :  { %1527 = vmatpush.bf16.msra.mxu0 %v1376_v47  ;;  %v2511_v47 = vld [vmem:[%s4133_s4 + $0x20] sm:$0xff] }
 0x2e2   :  { %1948 = vmatpush.bf16.msrb.mxu1 %v2511_v47 }
 0x2e3   :  { %2396 = vmatmul.msk.bf16.gmra.mxu1 %vm1490_vm2, %v3745_v54 }
 0x2e5   :  { %1528 = vmatpush.bf16.msra.mxu0 %v1374_v20  ;;  %v2509_v20 = vld [vmem:[%s4133_s4 + $0x10] sm:$0xff] }
 0x2e6   :  { %1949 = vmatpush.bf16.msrb.mxu1 %v2510_v9 }
 0x2e8   :  { %1529 = vmatmul.bf16.vlgmr.msra.gmra.mxu0 %v3735_v12 }
 0x2e9   :  { %2408 = vmatmul.msk.bf16.gmra.mxu3 %vm1490_vm2, %v3789_v4 }
 0x2ea   :  { %1950 = vmatpush.bf16.msrb.mxu1 %v2509_v20 }
 0x2ee   :  { %1951 = vmatpush.bf16.msrb.mxu1 %v2508_v50 }
 0x2f0   :  { %1657 = vmatmul.bf16.gmra.mxu2 %v3780_v16 }
 0x2f2   :  { %1952 = vmatpush.bf16.msrb.mxu1 %v2507_v7 }
 0x2f3   :  { %2397 = vmatmul.msk.bf16.gmra.mxu1 %vm1490_vm2, %v3767_v30 }
 0x2f8   :  { %1534 = vmatmul.bf16.gmra.mxu0 %v3758_v58 }
 0x2f9   :  { %2409 = vmatmul.msk.bf16.gmra.mxu3 %vm1490_vm2, %v3811_v1 }
 0x300   :  { %1662 = vmatmul.bf16.gmra.mxu2 %v3802_v55 }
 0x303   :  { %2398 = vmatmul.msk.bf16.gmra.mxu1 %vm1490_vm2, %v3789_v4 }
 0x308   :  { %1539 = vmatmul.bf16.gmra.mxu0 %v3780_v16 }
 0x309   :  { %2410 = vmatmul.msk.bf16.gmra.mxu3 %vm1490_vm2, %v3833_v39 }
 0x310   :  { %1667 = vmatmul.bf16.gmra.mxu2 %v3824_v15 }
 0x313   :  { %2399 = vmatmul.msk.bf16.gmra.mxu1 %vm1490_vm2, %v3811_v1 }
 0x315   :  { %v3864_v0 = vpop.f32.mrf.mxu3 }
 0x318   :  { %1544 = vmatmul.bf16.gmra.mxu0 %v3802_v55 }
 0x319   :  { %2411 = vmatmul.msk.bf16.gmra.mxu3 %vm1490_vm2, %v3858_v38 }
 0x31d   :  { %v3881_v57 = vpop.f32.mrf.mxu3 }
 0x320   :  { %1672 = vmatmul.bf16.gmra.mxu2 %v3846_v14 }
 0x323   :  { %2400 = vmatmul.msk.bf16.gmra.mxu1 %vm1490_vm2, %v3833_v39 }
 0x325   :  { %v3907_v36 = vpop.f32.mrf.mxu3 }
 0x328   :  { %1549 = vmatmul.bf16.gmra.mxu0 %v3824_v15 }
 0x329   :  { %2412 = vmatmul.msk.bf16.gmra.mxu3 %vm1490_vm2, %v3895_v48 }
 0x32d   :  { %v1714_v24 = vpop.f32.mrf.mxu3 }
 0x330   :  { %1677 = vmatmul.bf16.gmra.mxu2 %v3879_v49  ;;  %v3887_v27 = vpop.f32.mrf.mxu1 }
 0x333   :  { %2401 = vmatmul.msk.bf16.gmra.mxu1 %vm1490_vm2, %v3858_v38 }
 0x338   :  { %1554 = vmatmul.bf16.gmra.mxu0 %v3846_v14  ;;  %v3913_v19 = vpop.f32.mrf.mxu1 }
 0x33c   :  { %v3946_v5 = vpop.f32.mrf.mxu3 }
 0x340   :  { %1682 = vmatmul.bf16.gmra.mxu2 %v3927_v10  ;;  %v3936_v17 = vpop.f32.mrf.mxu1 }
 0x343   :  { %2402 = vmatmul.msk.bf16.gmra.mxu1 %vm1490_vm2, %v3895_v48 }
 0x344   :  { %v1719_v29 = vpop.f32.mrf.mxu3 }
 0x348   :  { %1559 = vmatmul.bf16.gmra.mxu0 %v3879_v49  ;;  %v3958_v18 = vpop.f32.mrf.mxu1 }
 0x34c   :  { %v3984_v60 = vpop.f32.mrf.mxu3 }
 0x350   :  { %1687 = vmatmul.bf16.gmra.mxu2 %v3960_v56  ;;  %v3974_v44 = vpop.f32.mrf.mxu1 }
 0x353   :  { %v1648_v51 = vpop.f32.mrf.mxu2 }
 0x354   :  { %v1649_v37 = vadd.f32 %v1648_v51, %v3972_v40  ;;  %v1724_v3 = vpop.f32.mrf.mxu3 }
 0x356   :  { %v1708_v62 = vadd.f32 %v3864_v0, %v1649_v37 }
 0x358   :  { %1564 = vmatmul.bf16.gmra.mxu0 %v3927_v10  ;;  %v3991_v53 = vpop.f32.mrf.mxu1  ;;  %v1758_v61 = vmax.f32 %v1708_v62, 0.0 }
 0x35b   :  { %v1650_v23 = vpop.f32.mrf.mxu2 }
 0x35c   :  { %v1651_v42 = vadd.f32 %v1650_v23, %v3972_v40  ;;  %v4005_v9 = vpop.f32.mrf.mxu3 }
 0x35e   :  { %v1710_v28 = vadd.f32 %v3881_v57, %v1651_v42 }
 0x360   :  { %v1760_v32 = vmax.f32 %v1710_v28, 0.0  ;;  %1692 = vmatmul.bf16.gmra.mxu2 %v3988_v63  ;;  %v3998_v2 = vpop.f32.mrf.mxu1 }
 0x362   :  { %v1798_v25 = vpack.c.bf16 %v1760_v32, %v1758_v61 }
 0x363   :  { %v1653_v26 = vpop.f32.mrf.mxu2 }
 0x364   :  { %2012 = vmatmul.bf16.vlgmr.msrb.gmra.mxu3 %v1798_v25  ;;  %v1654_v0 = vadd.f32 %v1653_v26, %v3972_v40 }
 0x365   :  { %v1530_v11 = vpop.f32.mrf.mxu0 }
 0x366   :  { %v1531_v57 = vadd.f32 %v1530_v11, %v3994_v41  ;;  %v1713_v35 = vadd.f32 %v3907_v36, %v1654_v0 }
 0x368   :  { %1569 = vmatmul.bf16.gmra.mxu0 %v3960_v56  ;;  %v1590_v22 = vadd.f32 %v3887_v27, %v1531_v57  ;;  %v1762_v21 = vmax.f32 %v1713_v35, 0.0  ;;  %v4008_v37 = vpop.f32.mrf.mxu1 }
 0x36a   :  { %v1757_v50 = vmax.f32 %v1590_v22, 0.0 }
 0x36b   :  { %v1655_v6 = vpop.f32.mrf.mxu2 }
 0x36c   :  { %v1656_v52 = vadd.f32 %v1655_v6, %v3972_v40 }
 0x36d   :  { %v1532_v31 = vpop.f32.mrf.mxu0 }
 0x36e   :  { %v1715_v34 = vadd.f32 %v1714_v24, %v1656_v52  ;;  %v1533_v47 = vadd.f32 %v1532_v31, %v3994_v41  ;;  %v1729_v24 = vpop.f32.mrf.mxu3 }
 0x370   :  { %v1592_v33 = vadd.f32 %v3913_v19, %v1533_v47  ;;  %v1764_v20 = vmax.f32 %v1715_v34, 0.0  ;;  %v4015_v28 = vpop.f32.mrf.mxu1 }
 0x372   :  { %v1759_v45 = vmax.f32 %v1592_v33, 0.0  ;;  %v1800_v7 = vpack.c.bf16 %v1764_v20, %v1762_v21 }
 0x373   :  { %v1658_v51 = vpop.f32.mrf.mxu2 }
 0x374   :  { %2017 = vmatmul.bf16.gmra.mxu3 %v1800_v7  ;;  %v1797_v36 = vpack.c.bf16 %v1759_v45, %v1757_v50  ;;  %v1659_v27 = vadd.f32 %v1658_v51, %v3972_v40 }
 0x375   :  { %v1535_v43 = vpop.f32.mrf.mxu0 }
 0x376   :  { %1953 = vmatmul.bf16.vlgmr.msrb.gmra.mxu1 %v1797_v36  ;;  %v1536_v59 = vadd.f32 %v1535_v43, %v3994_v41  ;;  %v1718_v19 = vadd.f32 %v3946_v5, %v1659_v27  ;;  %v1732_v31 = vpop.f32.mrf.mxu3 }
 0x378   :  { %1574 = vmatmul.bf16.gmra.mxu0 %v3988_v63  ;;  %v1595_v61 = vadd.f32 %v3936_v17, %v1536_v59  ;;  %v1766_v26 = vmax.f32 %v1718_v19, 0.0  ;;  %v1611_v34 = vpop.f32.mrf.mxu1 }
 0x37a   :  { %v1761_v57 = vmax.f32 %v1595_v61, 0.0 }
 0x37b   :  { %v1660_v23 = vpop.f32.mrf.mxu2 }
 0x37c   :  { %v1661_v62 = vadd.f32 %v1660_v23, %v3972_v40 }
 0x37d   :  { %v1537_v42 = vpop.f32.mrf.mxu0 }
 0x37e   :  { %v1720_v32 = vadd.f32 %v1719_v29, %v1661_v62  ;;  %v1538_v25 = vadd.f32 %v1537_v42, %v3994_v41  ;;  %v1734_v20 = vpop.f32.mrf.mxu3 }
 0x380   :  { %v1768_v11 = vmax.f32 %v1720_v32, 0.0  ;;  %v1597_v0 = vadd.f32 %v3958_v18, %v1538_v25  ;;  %v4027_v27 = vpop.f32.mrf.mxu1 }
 0x382   :  { %v1802_v6 = vpack.c.bf16 %v1768_v11, %v1766_v26  ;;  %v1763_v35 = vmax.f32 %v1597_v0, 0.0 }
 0x383   :  { %v1663_v52 = vpop.f32.mrf.mxu2 }
 0x384   :  { %2022 = vmatmul.bf16.gmra.mxu3 %v1802_v6  ;;  %v1799_v5 = vpack.c.bf16 %v1763_v35, %v1761_v57  ;;  %v1664_v47 = vadd.f32 %v1663_v52, %v3972_v40 }
 0x385   :  { %v1540_v22 = vpop.f32.mrf.mxu0 }
 0x386   :  { %1958 = vmatmul.bf16.gmra.mxu1 %v1799_v5  ;;  %v1541_v17 = vadd.f32 %v1540_v22, %v3994_v41  ;;  %v1723_v21 = vadd.f32 %v3984_v60, %v1664_v47  ;;  %v1737_v61 = vpop.f32.mrf.mxu3 }
 0x388   :  { %v1600_v50 = vadd.f32 %v3974_v44, %v1541_v17  ;;  %v1770_v51 = vmax.f32 %v1723_v21, 0.0  ;;  %v1616_v25 = vpop.f32.mrf.mxu1 }
 0x38a   :  { %v1765_v59 = vmax.f32 %v1600_v50, 0.0 }
 0x38b   :  { %v1665_v29 = vpop.f32.mrf.mxu2 }
 0x38c   :  { %v1666_v33 = vadd.f32 %v1665_v29, %v3972_v40 }
 0x38d   :  { %v1542_v18 = vpop.f32.mrf.mxu0 }
 0x38e   :  { %v1725_v45 = vadd.f32 %v1724_v3, %v1666_v33  ;;  %v1543_v7 = vadd.f32 %v1542_v18, %v3994_v41  ;;  %v1739_v22 = vpop.f32.mrf.mxu3 }
 0x390   :  { %v1772_v36 = vmax.f32 %v1725_v45, 0.0  ;;  %v1602_v43 = vadd.f32 %v3991_v53, %v1543_v7  ;;  %v1619_v18 = vpop.f32.mrf.mxu1 }
 0x392   :  { %v1767_v23 = vmax.f32 %v1602_v43, 0.0  ;;  %v1804_v19 = vpack.c.bf16 %v1772_v36, %v1770_v51 }
 0x393   :  { %v1668_v62 = vpop.f32.mrf.mxu2 }
 0x394   :  { %2027 = vmatmul.bf16.gmra.mxu3 %v1804_v19  ;;  %v1801_v60 = vpack.c.bf16 %v1767_v23, %v1765_v59  ;;  %v1669_v44 = vadd.f32 %v1668_v62, %v3972_v40 }
 0x395   :  { %v1545_v42 = vpop.f32.mrf.mxu0 }
 0x396   :  { %1963 = vmatmul.bf16.gmra.mxu1 %v1801_v60  ;;  %v1546_v3 = vadd.f32 %v1545_v42, %v3994_v41  ;;  %v1728_v26 = vadd.f32 %v4005_v9, %v1669_v44  ;;  %v1742_v45 = vpop.f32.mrf.mxu3 }
 0x398   :  { %v1605_v0 = vadd.f32 %v3998_v2, %v1546_v3  ;;  %v1774_v35 = vmax.f32 %v1728_v26, 0.0  ;;  %v1621_v23 = vpop.f32.mrf.mxu1 }
 0x39a   :  { %v1769_v47 = vmax.f32 %v1605_v0, 0.0 }
 0x39b   :  { %v1670_v32 = vpop.f32.mrf.mxu2 }
 0x39c   :  { %v1671_v53 = vadd.f32 %v1670_v32, %v3972_v40 }
 0x39d   :  { %v1547_v11 = vpop.f32.mrf.mxu0 }
 0x39e   :  { %v1730_v57 = vadd.f32 %v1729_v24, %v1671_v53  ;;  %v1548_v6 = vadd.f32 %v1547_v11, %v3994_v41 }
 0x3a0   :  { %v1776_v52 = vmax.f32 %v1730_v57, 0.0  ;;  %v1607_v5 = vadd.f32 %v4008_v37, %v1548_v6  ;;  %v1624_v0 = vpop.f32.mrf.mxu1 }
 0x3a2   :  { %v1771_v17 = vmax.f32 %v1607_v5, 0.0  ;;  %v1806_v29 = vpack.c.bf16 %v1776_v52, %v1774_v35 }
 0x3a3   :  { %v1673_v21 = vpop.f32.mrf.mxu2 }
 0x3a4   :  { %2032 = vmatmul.bf16.gmra.mxu3 %v1806_v29  ;;  %v1803_v33 = vpack.c.bf16 %v1771_v17, %v1769_v47  ;;  %v1674_v50 = vadd.f32 %v1673_v21, %v3972_v40 }
 0x3a5   :  { %v1550_v9 = vpop.f32.mrf.mxu0 }
 0x3a6   :  { %1968 = vmatmul.bf16.gmra.mxu1 %v1803_v33  ;;  %v1551_v2 = vadd.f32 %v1550_v9, %v3994_v41  ;;  %v1733_v7 = vadd.f32 %v1732_v31, %v1674_v50  ;;  %v1744_v31 = vpop.f32.mrf.mxu3 }
 0x3a8   :  { %v1610_v36 = vadd.f32 %v4015_v28, %v1551_v2  ;;  %v1778_v19 = vmax.f32 %v1733_v7, 0.0  ;;  %v1626_v2 = vpop.f32.mrf.mxu1 }
 0x3aa   :  { %v1773_v42 = vmax.f32 %v1610_v36, 0.0 }
 0x3ab   :  { %v1675_v24 = vpop.f32.mrf.mxu2 }
 0x3ac   :  { %v1676_v51 = vadd.f32 %v1675_v24, %v3972_v40 }
 0x3ad   :  { %v1552_v37 = vpop.f32.mrf.mxu0 }
 0x3ae   :  { %v1735_v43 = vadd.f32 %v1734_v20, %v1676_v51  ;;  %v1553_v59 = vadd.f32 %v1552_v37, %v3994_v41  ;;  %v1747_v47 = vpop.f32.mrf.mxu3 }
 0x3b0   :  { %v1780_v62 = vmax.f32 %v1735_v43, 0.0  ;;  %v1612_v60 = vadd.f32 %v1611_v34, %v1553_v59  ;;  %v1629_v59 = vpop.f32.mrf.mxu1 }
 0x3b2   :  { %v1775_v44 = vmax.f32 %v1612_v60, 0.0  ;;  %v1808_v3 = vpack.c.bf16 %v1780_v62, %v1778_v19 }
 0x3b3   :  { %v1678_v32 = vpop.f32.mrf.mxu2 }
 0x3b4   :  { %2037 = vmatmul.bf16.gmra.mxu3 %v1808_v3  ;;  %v1805_v26 = vpack.c.bf16 %v1775_v44, %v1773_v42  ;;  %v1679_v11 = vadd.f32 %v1678_v32, %v3972_v40 }
 0x3b5   :  { %v1555_v53 = vpop.f32.mrf.mxu0 }
 0x3b6   :  { %1973 = vmatmul.bf16.gmra.mxu1 %v1805_v26  ;;  %v1556_v28 = vadd.f32 %v1555_v53, %v3994_v41  ;;  %v1738_v57 = vadd.f32 %v1737_v61, %v1679_v11  ;;  %v1749_v37 = vpop.f32.mrf.mxu3 }
 0x3b8   :  { %v1615_v34 = vadd.f32 %v4027_v27, %v1556_v28  ;;  %v1782_v17 = vmax.f32 %v1738_v57, 0.0 }
 0x3ba   :  { %v1777_v33 = vmax.f32 %v1615_v34, 0.0 }
 0x3bb   :  { %v1680_v20 = vpop.f32.mrf.mxu2 }
 0x3bc   :  { %v1681_v6 = vadd.f32 %v1680_v20, %v3972_v40 }
 0x3bd   :  { %v1557_v35 = vpop.f32.mrf.mxu0 }
 0x3be   :  { %v1740_v52 = vadd.f32 %v1739_v22, %v1681_v6  ;;  %v1558_v5 = vadd.f32 %v1557_v35, %v3994_v41  ;;  %v1752_v28 = vpop.f32.mrf.mxu3 }
 0x3c0   :  { %v1784_v29 = vmax.f32 %v1740_v52, 0.0  ;;  %v1617_v21 = vadd.f32 %v1616_v25, %v1558_v5 }
 0x3c2   :  { %v1779_v9 = vmax.f32 %v1617_v21, 0.0  ;;  %v1810_v50 = vpack.c.bf16 %v1784_v29, %v1782_v17 }
 0x3c3   :  { %v1683_v24 = vpop.f32.mrf.mxu2 }
 0x3c4   :  { %2042 = vmatmul.bf16.gmra.mxu3 %v1810_v50  ;;  %v1807_v7 = vpack.c.bf16 %v1779_v9, %v1777_v33  ;;  %v1684_v51 = vadd.f32 %v1683_v24, %v3972_v40 }
 0x3c5   :  { %v1560_v61 = vpop.f32.mrf.mxu0 }
 0x3c6   :  { %1978 = vmatmul.bf16.gmra.mxu1 %v1807_v7  ;;  %v1561_v27 = vadd.f32 %v1560_v61, %v3994_v41  ;;  %v1743_v36 = vadd.f32 %v1742_v45, %v1684_v51  ;;  %v1631_v45 = vpop.f32.mrf.mxu1 }
 0x3c8   :  { %v1620_v19 = vadd.f32 %v1619_v18, %v1561_v27  ;;  %v1786_v42 = vmax.f32 %v1743_v36, 0.0 }
 0x3ca   :  { %v1781_v32 = vmax.f32 %v1620_v19, 0.0 }
 0x3cb   :  { %v1685_v22 = vpop.f32.mrf.mxu2 }
 0x3cc   :  { %v1686_v43 = vadd.f32 %v1685_v22, %v3972_v40 }
 0x3cd   :  { %v1562_v25 = vpop.f32.mrf.mxu0 }
 0x3ce   :  { %v1745_v62 = vadd.f32 %v1744_v31, %v1686_v43  ;;  %v1563_v60 = vadd.f32 %v1562_v25, %v3994_v41  ;;  %v1634_v50 = vpop.f32.mrf.mxu1 }
 0x3d0   :  { %v1788_v44 = vmax.f32 %v1745_v62, 0.0  ;;  %v1622_v3 = vadd.f32 %v1621_v23, %v1563_v60  ;;  %v1754_v23 = vpop.f32.mrf.mxu3 }
 0x3d2   :  { %v1783_v26 = vmax.f32 %v1622_v3, 0.0  ;;  %v1812_v53 = vpack.c.bf16 %v1788_v44, %v1786_v42 }
 0x3d3   :  { %v1688_v11 = vpop.f32.mrf.mxu2 }
 0x3d4   :  { %2047 = vmatmul.bf16.gmra.mxu3 %v1812_v53  ;;  %v1809_v20 = vpack.c.bf16 %v1783_v26, %v1781_v32  ;;  %v1689_v6 = vadd.f32 %v1688_v11, %v3972_v40 }
 0x3d5   :  { %v1565_v57 = vpop.f32.mrf.mxu0 }
 0x3d6   :  { %1983 = vmatmul.bf16.gmra.mxu1 %v1809_v20  ;;  %v1566_v18 = vadd.f32 %v1565_v57, %v3994_v41  ;;  %v1748_v35 = vadd.f32 %v1747_v47, %v1689_v6 }
 0x3d8   :  { %v1625_v5 = vadd.f32 %v1624_v0, %v1566_v18  ;;  %v1790_v21 = vmax.f32 %v1748_v35, 0.0 }
 0x3da   :  { %v1785_v24 = vmax.f32 %v1625_v5, 0.0 }
 0x3db   :  { %v1690_v31 = vpop.f32.mrf.mxu2 }
 0x3dc   :  { %v1691_v34 = vadd.f32 %v1690_v31, %v3972_v40 }
 0x3dd   :  { %v1567_v52 = vpop.f32.mrf.mxu0 }
 0x3de   :  { %v1750_v17 = vadd.f32 %v1749_v37, %v1691_v34  ;;  %v1568_v29 = vadd.f32 %v1567_v52, %v3994_v41  ;;  %v1636_v37 = vpop.f32.mrf.mxu1 }
 0x3e0   :  { %v1792_v33 = vmax.f32 %v1750_v17, 0.0  ;;  %v1627_v9 = vadd.f32 %v1626_v2, %v1568_v29 }
 0x3e2   :  { %v1787_v7 = vmax.f32 %v1627_v9, 0.0  ;;  %v1814_v61 = vpack.c.bf16 %v1792_v33, %v1790_v21 }
 0x3e3   :  { %v1693_v51 = vpop.f32.mrf.mxu2 }
 0x3e4   :  { %2052 = vmatmul.bf16.gmra.mxu3 %v1814_v61  ;;  %v1811_v27 = vpack.c.bf16 %v1787_v7, %v1785_v24  ;;  %v1694_v36 = vadd.f32 %v1693_v51, %v3972_v40 }
 0x3e5   :  { %v1570_v22 = vpop.f32.mrf.mxu0 }
 0x3e6   :  { %1988 = vmatmul.bf16.gmra.mxu1 %v1811_v27  ;;  %v1571_v0 = vadd.f32 %v1570_v22, %v3994_v41  ;;  %v1753_v25 = vadd.f32 %v1752_v28, %v1694_v36 }
 0x3e7   :  { %v2013_v47 = vpop.f32.mrf.mxu3 }
 0x3e8   :  { %v1630_v62 = vadd.f32 %v1629_v59, %v1571_v0  ;;  %v1794_v3 = vmax.f32 %v1753_v25, 0.0 }
 0x3ea   :  { %v1789_v53 = vmax.f32 %v1630_v62, 0.0 }
 0x3eb   :  { %v1695_v43 = vpop.f32.mrf.mxu2 }
 0x3ec   :  { %v1696_v19 = vadd.f32 %v1695_v43, %v3972_v40 }
 0x3ed   :  { %v1572_v2 = vpop.f32.mrf.mxu0 }
 0x3ee   :  { %v1755_v60 = vadd.f32 %v1754_v23, %v1696_v19  ;;  %v1573_v42 = vadd.f32 %v1572_v2, %v3994_v41 }
 0x3ef   :  { %v2015_v44 = vpop.f32.mrf.mxu3 }
 0x3f0   :  { %v1796_v32 = vmax.f32 %v1755_v60, 0.0  ;;  %v1632_v26 = vadd.f32 %v1631_v45, %v1573_v42 }
 0x3f2   :  { %v1791_v11 = vmax.f32 %v1632_v26, 0.0  ;;  %v1816_v20 = vpack.c.bf16 %v1796_v32, %v1794_v3 }
 0x3f3   :  { %v1954_v57 = vpop.f32.mrf.mxu1 }
 0x3f4   :  { %v4058_v6 = vadd.f32 %v2013_v47, %v1954_v57  ;;  %2057 = vmatmul.bf16.gmra.mxu3 %v1816_v20  ;;  %v1813_v18 = vpack.c.bf16 %v1791_v11, %v1789_v53 }
 0x3f5   :  { %v1575_v28 = vpop.f32.mrf.mxu0 }
 0x3f6   :  { %1993 = vmatmul.bf16.gmra.mxu1 %v1813_v18  ;;  %v1576_v59 = vadd.f32 %v1575_v28, %v3994_v41 }
 0x3f7   :  { %v2018_v40 = vpop.f32.mrf.mxu3 }
 0x3f8   :  { %v1635_v52 = vadd.f32 %v1634_v50, %v1576_v59 }
 0x3fa   :  { %v1793_v29 = vmax.f32 %v1635_v52, 0.0 }
 0x3fb   :  { %v1956_v31 = vpop.f32.mrf.mxu1 }
 0x3fc   :  { %v4061_v35 = vadd.f32 %v2015_v44, %v1956_v31 }
 0x3fd   :  { %v1577_v34 = vpop.f32.mrf.mxu0 }
 0x3fe   :  { %v1578_v45 = vadd.f32 %v1577_v34, %v3994_v41  ;;  %v2063_v23 = vpack.c.bf16 %v4061_v35, %v4058_v6 }
 0x3ff   :  { %v2020_v5 = vpop.f32.mrf.mxu3 }
 0x400   :  { %v1637_v17 = vadd.f32 %v1636_v37, %v1578_v45 }
 0x402   :  { %v1795_v21 = vmax.f32 %v1637_v17, 0.0 }
 0x403   :  { %v1959_v33 = vpop.f32.mrf.mxu1 }
 0x404   :  { %v2019_v9 = vadd.f32 %v2018_v40, %v1959_v33  ;;  %v1815_v24 = vpack.c.bf16 %v1795_v21, %v1793_v29 }
 0x406   :  { %1998 = vmatmul.bf16.gmra.mxu1 %v1815_v24 }
 0x407   :  { %v2023_v7 = vpop.f32.mrf.mxu3 }
 0x40b   :  { %v1961_v61 = vpop.f32.mrf.mxu1 }
 0x40c   :  { %v2021_v51 = vadd.f32 %v2020_v5, %v1961_v61 }
 0x40e   :  { %v2064_v27 = vpack.c.bf16 %v2021_v51, %v2019_v9 }
 0x40f   :  { %v2025_v22 = vpop.f32.mrf.mxu3 }
 0x413   :  { %v1964_v47 = vpop.f32.mrf.mxu1 }
 0x414   :  { %v2024_v50 = vadd.f32 %v2023_v7, %v1964_v47 }
 0x417   :  { %v2028_v36 = vpop.f32.mrf.mxu3 }
 0x41b   :  { %v1966_v41 = vpop.f32.mrf.mxu1 }
 0x41c   :  { %v2026_v0 = vadd.f32 %v2025_v22, %v1966_v41 }
 0x41e   :  { %v2065_v43 = vpack.c.bf16 %v2026_v0, %v2024_v50 }
 0x41f   :  { %v2030_v25 = vpop.f32.mrf.mxu3 }
 0x423   :  { %v1969_v19 = vpop.f32.mrf.mxu1 }
 0x424   :  { %v2029_v37 = vadd.f32 %v2028_v36, %v1969_v19 }
 0x427   :  { %v2033_v2 = vpop.f32.mrf.mxu3 }
 0x42b   :  { %v1971_v62 = vpop.f32.mrf.mxu1 }
 0x42c   :  { %v2031_v60 = vadd.f32 %v2030_v25, %v1971_v62 }
 0x42e   :  { %v2066_v42 = vpack.c.bf16 %v2031_v60, %v2029_v37 }
 0x42f   :  { %v2035_v44 = vpop.f32.mrf.mxu3 }
 0x433   :  { %v1974_v3 = vpop.f32.mrf.mxu1 }
 0x434   :  { %v2034_v32 = vadd.f32 %v2033_v2, %v1974_v3 }
 0x437   :  { %v2038_v26 = vpop.f32.mrf.mxu3 }
 0x43b   :  { %v1976_v53 = vpop.f32.mrf.mxu1 }
 0x43c   :  { %v2036_v22 = vadd.f32 %v2035_v44, %v1976_v53 }
 0x43e   :  { %v2067_v36 = vpack.c.bf16 %v2036_v22, %v2034_v32 }
 0x43f   :  { %v2040_v11 = vpop.f32.mrf.mxu3 }
 0x443   :  { %v1979_v20 = vpop.f32.mrf.mxu1 }
 0x444   :  { %v2039_v51 = vadd.f32 %v2038_v26, %v1979_v20 }
 0x447   :  { %v2043_v57 = vpop.f32.mrf.mxu3 }
 0x44b   :  { %v1981_v18 = vpop.f32.mrf.mxu1 }
 0x44c   :  { %v2041_v24 = vadd.f32 %v2040_v11, %v1981_v18 }
 0x44e   :  { %v2068_v47 = vpack.c.bf16 %v2041_v24, %v2039_v51 }
 0x44f   :  { %v2045_v28 = vpop.f32.mrf.mxu3 }
 0x453   :  { %v1984_v40 = vpop.f32.mrf.mxu1 }
 0x454   :  { %v2044_v9 = vadd.f32 %v2043_v57, %v1984_v40 }
 0x457   :  { %v2048_v59 = vpop.f32.mrf.mxu3 }
 0x45b   :  { %v1986_v31 = vpop.f32.mrf.mxu1 }
 0x45c   :  { %v2046_v21 = vadd.f32 %v2045_v28, %v1986_v31 }
 0x45e   :  { %v2069_v7 = vpack.c.bf16 %v2046_v21, %v2044_v9 }
 0x45f   :  { %v2050_v34 = vpop.f32.mrf.mxu3 }
 0x463   :  { %v1989_v52 = vpop.f32.mrf.mxu1 }
 0x464   :  { %v2049_v5 = vadd.f32 %v2048_v59, %v1989_v52 }
 0x467   :  { %v2053_v29 = vpop.f32.mrf.mxu3 }
 0x46b   :  { %v1991_v45 = vpop.f32.mrf.mxu1 }
 0x46c   :  { %v2051_v17 = vadd.f32 %v2050_v34, %v1991_v45 }
 0x46e   :  { %v2070_v33 = vpack.c.bf16 %v2051_v17, %v2049_v5 }
 0x46f   :  { %v2055_v50 = vpop.f32.mrf.mxu3 }
 0x470   :  { %2077 = vmatpush.bf16.msrb.mxu0 %v2070_v33 }
 0x473   :  { %v1994_v61 = vpop.f32.mrf.mxu1 }
 0x474   :  { %2078 = vmatpush.bf16.msrb.mxu0 %v2069_v7  ;;  %v2054_v3 = vadd.f32 %v2053_v29, %v1994_v61 }
 0x477   :  { %v2058_v0 = vpop.f32.mrf.mxu3 }
 0x478   :  { %2079 = vmatpush.bf16.msrb.mxu0 %v2068_v47 }
 0x47b   :  { %v1996_v41 = vpop.f32.mrf.mxu1 }
 0x47c   :  { %2080 = vmatpush.bf16.msrb.mxu0 %v2067_v36  ;;  %v2056_v60 = vadd.f32 %v2055_v50, %v1996_v41 }
 0x47e   :  { %v2071_v32 = vpack.c.bf16 %v2056_v60, %v2054_v3 }
 0x47f   :  { %v2060_v19 = vpop.f32.mrf.mxu3 }
 0x480   :  { %2081 = vmatpush.bf16.msrb.mxu0 %v2066_v42 }
 0x483   :  { %v1999_v25 = vpop.f32.mrf.mxu1 }
 0x484   :  { %2082 = vmatpush.bf16.msrb.mxu0 %v2065_v43  ;;  %v2059_v2 = vadd.f32 %v2058_v0, %v1999_v25 }
 0x488   :  { %2083 = vmatpush.bf16.msrb.mxu0 %v2064_v27 }
 0x48b   :  { %v2001_v37 = vpop.f32.mrf.mxu1 }
 0x48c   :  { %v2061_v62 = vadd.f32 %v2060_v19, %v2001_v37  ;;  %2084 = vmatpush.bf16.msrb.mxu0 %v2063_v23 }
 0x48e   :  { %v2072_v44 = vpack.c.bf16 %v2061_v62, %v2059_v2 }
 0x48f   :  { %2085 = vmatmul.bf16.vlgmr.msrb.gmra.mxu0 %v3735_v12  ;;  %v4099_v12 = vld [vmem:[%s4134_s5] ss:$0 sm:$0xff]  ;;  %s2693_s5 = smov [#allocation3]  }
 0x490   :  { %2142 = vmatpush.bf16.msrb.mxu2 %v2072_v44  ;;  %s2239_s16 = sshll.u32 %s2693_s5, 4  ;;  %s2240_s16 = int_to_ptr.vmem [resolvable:$true] %s2239_s16 }
 0x494   :  { %2143 = vmatpush.bf16.msrb.mxu2 %v2071_v32 }
 0x497   :  { %2477 = vmatmul.msk.bf16.vlgmr.msrb.gmra.mxu2 %vm1490_vm2, %v3690_v13 }
 0x49f   :  { %2090 = vmatmul.bf16.gmra.mxu0 %v3758_v58 }
 0x4a7   :  { %2478 = vmatmul.msk.bf16.gmra.mxu2 %vm1490_vm2, %v3703_v8 }
 0x4af   :  { %2095 = vmatmul.bf16.gmra.mxu0 %v3780_v16 }
 0x4b7   :  { %2479 = vmatmul.msk.bf16.gmra.mxu2 %vm1490_vm2, %v3722_v46 }
 0x4bf   :  { %2100 = vmatmul.bf16.gmra.mxu0 %v3802_v55 }
 0x4c7   :  { %2480 = vmatmul.msk.bf16.gmra.mxu2 %vm1490_vm2, %v3745_v54 }
 0x4cf   :  { %2105 = vmatmul.bf16.gmra.mxu0 %v3824_v15 }
 0x4d7   :  { %2481 = vmatmul.msk.bf16.gmra.mxu2 %vm1490_vm2, %v3767_v30 }
 0x4df   :  { %2110 = vmatmul.bf16.gmra.mxu0 %v3846_v14 }
 0x4e7   :  { %2482 = vmatmul.msk.bf16.gmra.mxu2 %vm1490_vm2, %v3789_v4 }
 0x4ef   :  { %2115 = vmatmul.bf16.gmra.mxu0 %v3879_v49 }
 0x4f7   :  { %2483 = vmatmul.msk.bf16.gmra.mxu2 %vm1490_vm2, %v3811_v1 }
 0x4ff   :  { %2120 = vmatmul.bf16.gmra.mxu0 %v3927_v10 }
 0x507   :  { %2484 = vmatmul.msk.bf16.gmra.mxu2 %vm1490_vm2, %v3833_v39 }
 0x50c   :  { %v2086_v13 = vpop.f32.mrf.mxu0 }
 0x50d   :  { %v2087_v58 = vadd.f32 %v4099_v12, %v2086_v13 }
 0x50f   :  { %2125 = vmatmul.bf16.gmra.mxu0 %v3960_v56 }
 0x514   :  { %v2088_v8 = vpop.f32.mrf.mxu0 }
 0x515   :  { %v2089_v30 = vadd.f32 %v4099_v12, %v2088_v8 }
 0x517   :  { %2485 = vmatmul.msk.bf16.gmra.mxu2 %vm1490_vm2, %v3858_v38 }
 0x51a   :  { %v2145_v46 = vpop.f32.mrf.mxu2 }
 0x51b   :  { %v2146_v4 = vadd.f32 %v2145_v46, %v2087_v58 }
 0x51c   :  { %v2091_v54 = vpop.f32.mrf.mxu0 }
 0x51d   :  { %v2092_v38 = vadd.f32 %v4099_v12, %v2091_v54 }
 0x51f   :  { %2130 = vmatmul.bf16.gmra.mxu0 %v3988_v63 }
 0x522   :  { %v2147_v16 = vpop.f32.mrf.mxu2 }
 0x523   :  { %v2148_v55 = vadd.f32 %v2147_v16, %v2089_v30 }
 0x524   :  { %v2093_v1 = vpop.f32.mrf.mxu0 }
 0x525   :  { %v2526_v15 = vpack.c.bf16 %v2148_v55, %v2146_v4  ;;  %v2094_v49 = vadd.f32 %v4099_v12, %v2093_v1 }
 0x527   :  { %2527 = vst [vmem:[#allocation3] sm:$0xff] %v2526_v15   ;;  %2486 = vmatmul.msk.bf16.gmra.mxu2 %vm1490_vm2, %v3895_v48 }
 0x52a   :  { %v2150_v39 = vpop.f32.mrf.mxu2 }
 0x52b   :  { %v2151_v56 = vadd.f32 %v2150_v39, %v2092_v38 }
 0x52c   :  { %v2096_v14 = vpop.f32.mrf.mxu0 }
 0x52d   :  { %v2097_v43 = vadd.f32 %v4099_v12, %v2096_v14 }
 0x532   :  { %v2152_v10 = vpop.f32.mrf.mxu2 }
 0x533   :  { %v2153_v63 = vadd.f32 %v2152_v10, %v2094_v49 }
 0x534   :  { %v2098_v6 = vpop.f32.mrf.mxu0 }
 0x535   :  { %v2531_v35 = vpack.c.bf16 %v2153_v63, %v2151_v56  ;;  %v2099_v42 = vadd.f32 %v4099_v12, %v2098_v6 }
 0x537   :  { %2573 = vst [vmem:[#allocation3 + $0x8] sm:$0xff] %v2531_v35  }
 0x53a   :  { %v2155_v23 = vpop.f32.mrf.mxu2 }
 0x53b   :  { %v2156_v48 = vadd.f32 %v2155_v23, %v2097_v43 }
 0x53c   :  { %v2101_v27 = vpop.f32.mrf.mxu0 }
 0x53d   :  { %v2102_v28 = vadd.f32 %v4099_v12, %v2101_v27 }
 0x542   :  { %v2157_v26 = vpop.f32.mrf.mxu2 }
 0x543   :  { %v2158_v53 = vadd.f32 %v2157_v26, %v2099_v42 }
 0x544   :  { %v2103_v11 = vpop.f32.mrf.mxu0 }
 0x545   :  { %v2536_v20 = vpack.c.bf16 %v2158_v53, %v2156_v48  ;;  %v2104_v40 = vadd.f32 %v4099_v12, %v2103_v11 }
 0x547   :  { %2574 = vst [vmem:[#allocation3 + $0x10] sm:$0xff] %v2536_v20  }
 0x54a   :  { %v2160_v57 = vpop.f32.mrf.mxu2 }
 0x54b   :  { %v2161_v31 = vadd.f32 %v2160_v57, %v2102_v28 }
 0x54c   :  { %v2106_v18 = vpop.f32.mrf.mxu0 }
 0x54d   :  { %v2107_v29 = vadd.f32 %v4099_v12, %v2106_v18 }
 0x552   :  { %v2162_v59 = vpop.f32.mrf.mxu2 }
 0x553   :  { %v2163_v34 = vadd.f32 %v2162_v59, %v2104_v40 }
 0x554   :  { %v2108_v52 = vpop.f32.mrf.mxu0 }
 0x555   :  { %v2541_v45 = vpack.c.bf16 %v2163_v34, %v2161_v31  ;;  %v2109_v21 = vadd.f32 %v4099_v12, %v2108_v52 }
 0x557   :  { %2575 = vst [vmem:[#allocation3 + $0x18] sm:$0xff] %v2541_v45  }
 0x55a   :  { %v2165_v5 = vpop.f32.mrf.mxu2 }
 0x55b   :  { %v2166_v9 = vadd.f32 %v2165_v5, %v2107_v29 }
 0x55c   :  { %v2111_v17 = vpop.f32.mrf.mxu0 }
 0x55d   :  { %v2112_v47 = vadd.f32 %v4099_v12, %v2111_v17 }
 0x562   :  { %v2167_v33 = vpop.f32.mrf.mxu2 }
 0x563   :  { %v2168_v24 = vadd.f32 %v2167_v33, %v2109_v21 }
 0x564   :  { %v2113_v7 = vpop.f32.mrf.mxu0 }
 0x565   :  { %v2546_v61 = vpack.c.bf16 %v2168_v24, %v2166_v9  ;;  %v2114_v50 = vadd.f32 %v4099_v12, %v2113_v7 }
 0x567   :  { %2576 = vst [vmem:[#allocation3 + $0x20] sm:$0xff] %v2546_v61  }
 0x56a   :  { %v2170_v51 = vpop.f32.mrf.mxu2 }
 0x56b   :  { %v2171_v41 = vadd.f32 %v2170_v51, %v2112_v47 }
 0x56c   :  { %v2116_v22 = vpop.f32.mrf.mxu0 }
 0x56d   :  { %v2117_v62 = vadd.f32 %v4099_v12, %v2116_v22 }
 0x572   :  { %v2172_v36 = vpop.f32.mrf.mxu2 }
 0x573   :  { %v2173_v0 = vadd.f32 %v2172_v36, %v2114_v50 }
 0x574   :  { %v2118_v25 = vpop.f32.mrf.mxu0 }
 0x575   :  { %v2551_v19 = vpack.c.bf16 %v2173_v0, %v2171_v41  ;;  %v2119_v60 = vadd.f32 %v4099_v12, %v2118_v25 }
 0x577   :  { %2577 = vst [vmem:[#allocation3 + $0x28] sm:$0xff] %v2551_v19  }
 0x57a   :  { %v2175_v37 = vpop.f32.mrf.mxu2 }
 0x57b   :  { %v2176_v3 = vadd.f32 %v2175_v37, %v2117_v62 }
 0x57c   :  { %v2121_v2 = vpop.f32.mrf.mxu0 }
 0x57d   :  { %v2122_v54 = vadd.f32 %v4099_v12, %v2121_v2 }
 0x582   :  { %v2177_v44 = vpop.f32.mrf.mxu2 }
 0x583   :  { %v2178_v32 = vadd.f32 %v2177_v44, %v2119_v60 }
 0x584   :  { %v2123_v8 = vpop.f32.mrf.mxu0 }
 0x585   :  { %v2556_v13 = vpack.c.bf16 %v2178_v32, %v2176_v3  ;;  %v2124_v30 = vadd.f32 %v4099_v12, %v2123_v8 }
 0x587   :  { %2578 = vst [vmem:[#allocation3 + $0x30] sm:$0xff] %v2556_v13  }
 0x58a   :  { %v2180_v46 = vpop.f32.mrf.mxu2 }
 0x58b   :  { %v2181_v4 = vadd.f32 %v2180_v46, %v2122_v54 }
 0x58c   :  { %v2126_v58 = vpop.f32.mrf.mxu0 }
 0x58d   :  { %v2127_v14 = vadd.f32 %v4099_v12, %v2126_v58 }
 0x592   :  { %v2182_v16 = vpop.f32.mrf.mxu2 }
 0x593   :  { %v2183_v55 = vadd.f32 %v2182_v16, %v2124_v30 }
 0x594   :  { %v2128_v39 = vpop.f32.mrf.mxu0 }
 0x595   :  { %v2561_v1 = vpack.c.bf16 %v2183_v55, %v2181_v4  ;;  %v2129_v38 = vadd.f32 %v4099_v12, %v2128_v39 }
 0x597   :  { %2579 = vst [vmem:[#allocation3 + $0x38] sm:$0xff] %v2561_v1  }
 0x59a   :  { %v2185_v15 = vpop.f32.mrf.mxu2 }
 0x59b   :  { %v2186_v10 = vadd.f32 %v2185_v15, %v2127_v14 }
 0x59c   :  { %v2131_v63 = vpop.f32.mrf.mxu0 }
 0x59d   :  { %v2132_v27 = vadd.f32 %v4099_v12, %v2131_v63 }
 0x5a2   :  { %v2187_v49 = vpop.f32.mrf.mxu2 }
 0x5a3   :  { %v2188_v56 = vadd.f32 %v2187_v49, %v2129_v38 }
 0x5a4   :  { %v2133_v23 = vpop.f32.mrf.mxu0 }
 0x5a5   :  { %v2566_v6 = vpack.c.bf16 %v2188_v56, %v2186_v10  ;;  %v2134_v43 = vadd.f32 %v4099_v12, %v2133_v23 }
 0x5a7   :  { %2580 = vst [vmem:[#allocation3 + $0x40] sm:$0xff] %v2566_v6  }
 0x5aa   :  { %v2190_v35 = vpop.f32.mrf.mxu2 }
 0x5ab   :  { %v2191_v26 = vadd.f32 %v2190_v35, %v2132_v27 }
 0x5b2   :  { %v2192_v42 = vpop.f32.mrf.mxu2 }
 0x5b3   :  { %v2193_v48 = vadd.f32 %v2192_v42, %v2134_v43 }
 0x5b5   :  { %v2571_v53 = vpack.c.bf16 %v2193_v48, %v2191_v26 }
 0x5b7   :  { %2581 = vst [vmem:[#allocation3 + $0x48] sm:$0xff] %v2571_v53  }
 0x5b8   :  { %2247 = dma.vmem_to_hbm [thread:$0]  %s2240_s16, 1280, %s2242_s19, [#allocation4], %s2692_s7, %s2692_s7, %s2694_s2  }
 0x5b9   :  { %2688 = dma.done.wait [#allocation4], 1280  }
 0x5ba   :  { %2689 = vsyncadd [#allocation4], 4294966016 }
 0x5bb   :  { %2252 = vsyncpa [#allocation4], 1 }

</bundles_post_ra>
